<compile_context>
chip_gen: v7x
topology: tpu7x:2x2x1
jax: 0.10.0
libtpu: 0.0.40
codegen_flags: <defaults>
</compile_context>

<pallas_src>
import math

import jax
import jax.numpy as jnp
import numpy as np
from jax.experimental import pallas as pl
from jax.experimental.pallas import tpu as pltpu


def _gelu_exact(x):
    # PyTorch nn.GELU default: exact erf-based GELU.
    return 0.5 * x * (1.0 + jax.lax.erf(x / jnp.sqrt(2.0).astype(x.dtype)))


def encoding_augment_kernel(x_ref, wdf_ref, bconv_ref, gamma_ref, beta_ref,
                            w1_ref, b1_ref, o_ref, col_ref, xf_ref):
    NB, C, L = x_ref.shape            # NB batch elements folded into lanes
    KC = wdf_ref.shape[1]
    K = KC // C
    pad = K // 2
    NL = NB * L                       # lane width of the working slabs

    # ---- im2col slab (K*C, NB*L) in VMEM (bf16 operands for the MXU) ------
    # col[k*C + c, nb*L + t] = x[nb, c, t + k - pad]   (0 outside [0, L))
    col_ref[...] = jnp.zeros_like(col_ref)       # zero padding regions once
    for k in range(K):                            # static unroll over taps
        s = k - pad
        src_lo = max(0, s)
        src_hi = min(L, L + s)
        dst_lo = max(0, -s)
        w = src_hi - src_lo
        for nb in range(NB):                      # static, NB is tiny
            col_ref[k * C:(k + 1) * C,
                    nb * L + dst_lo:nb * L + dst_lo + w] = (
                x_ref[nb, :, src_lo:src_hi].astype(col_ref.dtype))

    # ---- residual input folded to (C, NB*L), kept in f32 ------------------
    for nb in range(NB):
        xf_ref[:, nb * L:(nb + 1) * L] = x_ref[nb]
    x_f = xf_ref[...]                             # (C, NB*L) f32

    # ---- grouped Conv1d as ONE deep matmul on the MXU ----------------------
    #   (C, K*C) @ (K*C, NB*L), bf16 operands, f32 accumulation.
    rp = jnp.dot(wdf_ref[...], col_ref[...],
                 preferred_element_type=jnp.float32)
    rp = rp + bconv_ref[...]                      # bias (C,1) over lanes
    rp = _gelu_exact(rp)

    # ---- residual -----------------------------------------------------------
    y = x_f + rp                                  # (C, NB*L), f32

    # ---- LayerNorm over channels (per sequence position), f32 ---------------
    mean = jnp.mean(y, axis=0, keepdims=True)                   # (1, NB*L)
    var = jnp.mean((y - mean) * (y - mean), axis=0, keepdims=True)
    ln = (y - mean) * jax.lax.rsqrt(var + 1e-5)
    ln = ln * gamma_ref[...] + beta_ref[...]                    # (C, NB*L)

    # ---- 1x1 Conv1d (C -> 3C): (3C, C) @ (C, NB*L) on the MXU ----------------
    out = jnp.dot(w1_ref[...], ln.astype(w1_ref.dtype),
                  preferred_element_type=jnp.float32)
    o_ref[0] = out + b1_ref[...]                  # lane-dense (3C, NB*L) store


def _batches_per_step(B, L):
    """Fold enough batch elems into lanes to reach >=128 lanes (must divide B)."""
    nb = min(B, max(1, -(-128 // L)))   # ceil(128 / L), capped at B
    while B % nb:
        nb -= 1
    return nb


def encoding_augment_forward(x, params):
    """x: (B, C, L) float32. Returns (B, 3C, L) float32."""
    B, C, L = x.shape
    wd = params["wd"]                  # (K, C, C) dense per-tap conv weights
    K = wd.shape[0]
    C3 = params["w1"].shape[0]

    NB = _batches_per_step(B, L)       # batch elements folded into lanes
    G = B // NB                        # grid steps, all "parallel"
    NL = NB * L

    # Glue: fuse taps -> (C, K*C); bf16 operands for the MXU matmuls.
    wdf = jnp.transpose(wd, (1, 0, 2)).reshape(C, K * C).astype(jnp.bfloat16)
    w1 = params["w1"].astype(jnp.bfloat16)

    out = pl.pallas_call(
        encoding_augment_kernel,
        out_shape=jax.ShapeDtypeStruct((G, C3, NL), jnp.float32),
        grid_spec=pltpu.PrefetchScalarGridSpec(
            num_scalar_prefetch=0,
            grid=(G,),
            in_specs=[
                pl.BlockSpec((NB, C, L), lambda g: (g, 0, 0)),    # x (only input read of x)
                pl.BlockSpec((C, K * C), lambda g: (0, 0)),       # fused conv weight
                pl.BlockSpec((C, 1), lambda g: (0, 0)),           # conv bias
                pl.BlockSpec((C, 1), lambda g: (0, 0)),           # LN gamma
                pl.BlockSpec((C, 1), lambda g: (0, 0)),           # LN beta
                pl.BlockSpec((C3, C), lambda g: (0, 0)),          # 1x1 conv W
                pl.BlockSpec((C3, 1), lambda g: (0, 0)),          # 1x1 conv b
            ],
            out_specs=pl.BlockSpec((1, C3, NL), lambda g: (g, 0, 0)),
            scratch_shapes=[
                pltpu.VMEM((K * C, NL), jnp.bfloat16),            # im2col slab
                pltpu.VMEM((C, NL), jnp.float32),                 # folded x (f32)
            ],
        ),
        compiler_params=pltpu.CompilerParams(
            dimension_semantics=("parallel",)),
    )(x, wdf, params["b_conv"], params["gamma"], params["beta"], w1,
      params["b1"])

    # Layout plumbing only: unfold lanes (G, 3C, NB*L) -> (B, 3C, L).
    out = out.reshape(G, C3, NB, L).transpose(0, 2, 1, 3).reshape(B, C3, L)
    return out


def make_params(key, in_features=32, position_encoder=25, groups=16):
    """Deterministic parameter construction matching EncodingAugment.__init__."""
    C = in_features
    K = position_encoder
    C3 = 3 * C
    cpg = C // groups  # channels per group (in and out)

    k1, k2, k3 = jax.random.split(key, 3)

    # Grouped conv weight v ~ N(0, 2/transformer_dim), bias = 0.
    v = jax.random.normal(k1, (C, cpg, K), jnp.float32) * (2.0 / C3)
    # weight_norm(conv, dim=2): g[k] = ||v[:,:,k]||_F, w = g * v / ||v|| = v at init.
    g = jnp.sqrt(jnp.sum(v * v, axis=(0, 1), keepdims=True))
    w_eff = g * v / (jnp.sqrt(jnp.sum(v * v, axis=(0, 1), keepdims=True)) + 0.0)
    b_conv = jnp.zeros((C, 1), jnp.float32)

    # Build dense per-tap (C_out x C_in) block-diagonal matrices.
    wd = np.zeros((K, C, C), np.float32)
    w_np = np.asarray(w_eff)
    for co in range(C):
        grp = co // cpg
        for j in range(cpg):
            ci = grp * cpg + j
            wd[:, co, ci] = w_np[co, j, :]
    wd = jnp.asarray(wd)

    # LayerNorm defaults.
    gamma = jnp.ones((C, 1), jnp.float32)
    beta = jnp.zeros((C, 1), jnp.float32)

    # Pointwise Conv1d(C, 3C, 1): kaiming-uniform-like deterministic init.
    bound_w = 1.0 / math.sqrt(C)
    w1 = jax.random.uniform(k2, (C3, C), jnp.float32, -bound_w, bound_w)
    b1 = jax.random.uniform(k3, (C3, 1), jnp.float32, -bound_w, bound_w)

    return {"wd": wd, "b_conv": b_conv, "gamma": gamma, "beta": beta,
            "w1": w1, "b1": b1}


def reference_forward(x, params):
    """Pure-JAX f32 reference (matches the PyTorch eval-mode forward)."""
    B, C, L = x.shape
    wd = params["wd"]
    K = wd.shape[0]
    pad = K // 2
    xpad = jnp.pad(x, ((0, 0), (0, 0), (pad, pad)))
    rp = jnp.zeros((B, C, L), jnp.float32)
    for k in range(K):
        rp = rp + jnp.einsum("ij,bjt->bit", wd[k], xpad[:, :, k:k + L])
    rp = rp + params["b_conv"][None]
    rp = _gelu_exact(rp)
    y = x + rp
    mean = jnp.mean(y, axis=1, keepdims=True)
    var = jnp.mean((y - mean) ** 2, axis=1, keepdims=True)
    ln = (y - mean) * jax.lax.rsqrt(var + 1e-5)
    ln = ln * params["gamma"][None] + params["beta"][None]
    out = jnp.einsum("oi,bit->bot", params["w1"], ln) + params["b1"][None]
    return out


if __name__ == "__main__":
    # TODO(synk): training-time random span masking (_make_mask), the learned
    # mask_replacement substitution and dropout are stochastic training-only
    # ops; the inference path (masks=None, eval mode) is implemented here.
    key = jax.random.PRNGKey(0)
    kx, kp = jax.random.split(key)

    B, C, L = 2, 32, 64          # in_features=32 (divisible by groups=16)
    x = jax.random.normal(kx, (B, C, L), jnp.float32)
    params = make_params(kp, in_features=C, position_encoder=25, groups=16)

    fwd = jax.jit(encoding_augment_forward)
    out = jax.block_until_ready(fwd(x, params))

    ref = reference_forward(x, params)
    assert out.shape == (B, 3 * C, L)
    # Kernel uses bf16 matmul operands (f32 accumulation); compare loosely
    # against the pure-f32 reference.
    err = float(np.max(np.abs(np.asarray(out) - np.asarray(ref))))
    assert err < 3e-2, f"max abs error {err}"
    print("KERNEL_OK")
</pallas_src>

<mosaic_0001>
module attributes {stable_mosaic.version = 11 : i64} {
  func.func @encoding_augment_kernel(%arg0: i32, %arg1: memref<2x32x64xf32, #tpu.memory_space<vmem>>, %arg2: memref<32x800xbf16, #tpu.memory_space<vmem>>, %arg3: memref<32x1xf32, #tpu.memory_space<vmem>>, %arg4: memref<32x1xf32, #tpu.memory_space<vmem>>, %arg5: memref<32x1xf32, #tpu.memory_space<vmem>>, %arg6: memref<96x32xbf16, #tpu.memory_space<vmem>>, %arg7: memref<96x1xf32, #tpu.memory_space<vmem>>, %arg8: memref<1x96x128xf32, #tpu.memory_space<vmem>>, %arg9: memref<800x128xbf16, #tpu.memory_space<vmem>>, %arg10: memref<32x128xf32, #tpu.memory_space<vmem>>) attributes {dimension_semantics = [#tpu.dimension_semantics<parallel>], iteration_bounds = array<i64: 1>, scalar_prefetch = 0 : i64, scratch_operands = 2 : i64, tpu.core_type = #tpu.core_type<tc>, window_params = [{transform_indices = @transform_0, window_bounds = array<i64: 2, 32, 64>}, {pipeline_mode = #tpu.pipeline_mode<synchronous>, transform_indices = @transform_1, window_bounds = array<i64: 32, 800>}, {pipeline_mode = #tpu.pipeline_mode<synchronous>, transform_indices = @transform_2, window_bounds = array<i64: 32, 1>}, {pipeline_mode = #tpu.pipeline_mode<synchronous>, transform_indices = @transform_3, window_bounds = array<i64: 32, 1>}, {pipeline_mode = #tpu.pipeline_mode<synchronous>, transform_indices = @transform_4, window_bounds = array<i64: 32, 1>}, {pipeline_mode = #tpu.pipeline_mode<synchronous>, transform_indices = @transform_5, window_bounds = array<i64: 96, 32>}, {pipeline_mode = #tpu.pipeline_mode<synchronous>, transform_indices = @transform_6, window_bounds = array<i64: 96, 1>}, {transform_indices = @transform_7, window_bounds = array<i64: 1, 96, 128>}]} {
    %cst = arith.constant 0.000000e+00 : bf16
    %0 = vector.broadcast %cst : bf16 to vector<800x128xbf16>
    %c0 = arith.constant 0 : index
    %c0_0 = arith.constant 0 : index
    %1 = vector.load %arg9[%c0, %c0_0] : memref<800x128xbf16, #tpu.memory_space<vmem>>, vector<800x128xbf16>
    tpu.vector_store %arg9[%c0, %c0_0], %0 {strides = array<i32>} : memref<800x128xbf16, #tpu.memory_space<vmem>>, vector<800x128xbf16>,
    %c0_1 = arith.constant 0 : index
    %c0_2 = arith.constant 0 : index
    %c0_3 = arith.constant 0 : index
    %2 = vector.load %arg1[%c0_1, %c0_2, %c0_3] : memref<2x32x64xf32, #tpu.memory_space<vmem>>, vector<1x32x52xf32>
    %3 = vector.shape_cast %2 : vector<1x32x52xf32> to vector<32x52xf32>
    %4 = arith.truncf %3 : vector<32x52xf32> to vector<32x52xbf16>
    %c0_4 = arith.constant 0 : index
    %c12 = arith.constant 12 : index
    %5 = vector.load %arg9[%c0_4, %c12] : memref<800x128xbf16, #tpu.memory_space<vmem>>, vector<32x52xbf16>
    tpu.vector_store %arg9[%c0_4, %c12], %4 {strides = array<i32>} : memref<800x128xbf16, #tpu.memory_space<vmem>>, vector<32x52xbf16>,
    %c1 = arith.constant 1 : index
    %c0_5 = arith.constant 0 : index
    %c0_6 = arith.constant 0 : index
    %6 = vector.load %arg1[%c1, %c0_5, %c0_6] : memref<2x32x64xf32, #tpu.memory_space<vmem>>, vector<1x32x52xf32>
    %7 = vector.shape_cast %6 : vector<1x32x52xf32> to vector<32x52xf32>
    %8 = arith.truncf %7 : vector<32x52xf32> to vector<32x52xbf16>
    %c0_7 = arith.constant 0 : index
    %c76 = arith.constant 76 : index
    %9 = vector.load %arg9[%c0_7, %c76] : memref<800x128xbf16, #tpu.memory_space<vmem>>, vector<32x52xbf16>
    tpu.vector_store %arg9[%c0_7, %c76], %8 {strides = array<i32>} : memref<800x128xbf16, #tpu.memory_space<vmem>>, vector<32x52xbf16>,
    %c0_8 = arith.constant 0 : index
    %c0_9 = arith.constant 0 : index
    %c0_10 = arith.constant 0 : index
    %10 = vector.load %arg1[%c0_8, %c0_9, %c0_10] : memref<2x32x64xf32, #tpu.memory_space<vmem>>, vector<1x32x53xf32>
    %11 = vector.shape_cast %10 : vector<1x32x53xf32> to vector<32x53xf32>
    %12 = arith.truncf %11 : vector<32x53xf32> to vector<32x53xbf16>
    %c32 = arith.constant 32 : index
    %c11 = arith.constant 11 : index
    %13 = vector.load %arg9[%c32, %c11] : memref<800x128xbf16, #tpu.memory_space<vmem>>, vector<32x53xbf16>
    tpu.vector_store %arg9[%c32, %c11], %12 {strides = array<i32>} : memref<800x128xbf16, #tpu.memory_space<vmem>>, vector<32x53xbf16>,
    %c1_11 = arith.constant 1 : index
    %c0_12 = arith.constant 0 : index
    %c0_13 = arith.constant 0 : index
    %14 = vector.load %arg1[%c1_11, %c0_12, %c0_13] : memref<2x32x64xf32, #tpu.memory_space<vmem>>, vector<1x32x53xf32>
    %15 = vector.shape_cast %14 : vector<1x32x53xf32> to vector<32x53xf32>
    %16 = arith.truncf %15 : vector<32x53xf32> to vector<32x53xbf16>
    %c32_14 = arith.constant 32 : index
    %c75 = arith.constant 75 : index
    %17 = vector.load %arg9[%c32_14, %c75] : memref<800x128xbf16, #tpu.memory_space<vmem>>, vector<32x53xbf16>
    tpu.vector_store %arg9[%c32_14, %c75], %16 {strides = array<i32>} : memref<800x128xbf16, #tpu.memory_space<vmem>>, vector<32x53xbf16>,
    %c0_15 = arith.constant 0 : index
    %c0_16 = arith.constant 0 : index
    %c0_17 = arith.constant 0 : index
    %18 = vector.load %arg1[%c0_15, %c0_16, %c0_17] : memref<2x32x64xf32, #tpu.memory_space<vmem>>, vector<1x32x54xf32>
    %19 = vector.shape_cast %18 : vector<1x32x54xf32> to vector<32x54xf32>
    %20 = arith.truncf %19 : vector<32x54xf32> to vector<32x54xbf16>
    %c64 = arith.constant 64 : index
    %c10 = arith.constant 10 : index
    %21 = vector.load %arg9[%c64, %c10] : memref<800x128xbf16, #tpu.memory_space<vmem>>, vector<32x54xbf16>
    tpu.vector_store %arg9[%c64, %c10], %20 {strides = array<i32>} : memref<800x128xbf16, #tpu.memory_space<vmem>>, vector<32x54xbf16>,
    %c1_18 = arith.constant 1 : index
    %c0_19 = arith.constant 0 : index
    %c0_20 = arith.constant 0 : index
    %22 = vector.load %arg1[%c1_18, %c0_19, %c0_20] : memref<2x32x64xf32, #tpu.memory_space<vmem>>, vector<1x32x54xf32>
    %23 = vector.shape_cast %22 : vector<1x32x54xf32> to vector<32x54xf32>
    %24 = arith.truncf %23 : vector<32x54xf32> to vector<32x54xbf16>
    %c64_21 = arith.constant 64 : index
    %c74 = arith.constant 74 : index
    %25 = vector.load %arg9[%c64_21, %c74] : memref<800x128xbf16, #tpu.memory_space<vmem>>, vector<32x54xbf16>
    tpu.vector_store %arg9[%c64_21, %c74], %24 {strides = array<i32>} : memref<800x128xbf16, #tpu.memory_space<vmem>>, vector<32x54xbf16>,
    %c0_22 = arith.constant 0 : index
    %c0_23 = arith.constant 0 : index
    %c0_24 = arith.constant 0 : index
    %26 = vector.load %arg1[%c0_22, %c0_23, %c0_24] : memref<2x32x64xf32, #tpu.memory_space<vmem>>, vector<1x32x55xf32>
    %27 = vector.shape_cast %26 : vector<1x32x55xf32> to vector<32x55xf32>
    %28 = arith.truncf %27 : vector<32x55xf32> to vector<32x55xbf16>
    %c96 = arith.constant 96 : index
    %c9 = arith.constant 9 : index
    %29 = vector.load %arg9[%c96, %c9] : memref<800x128xbf16, #tpu.memory_space<vmem>>, vector<32x55xbf16>
    tpu.vector_store %arg9[%c96, %c9], %28 {strides = array<i32>} : memref<800x128xbf16, #tpu.memory_space<vmem>>, vector<32x55xbf16>,
    %c1_25 = arith.constant 1 : index
    %c0_26 = arith.constant 0 : index
    %c0_27 = arith.constant 0 : index
    %30 = vector.load %arg1[%c1_25, %c0_26, %c0_27] : memref<2x32x64xf32, #tpu.memory_space<vmem>>, vector<1x32x55xf32>
    %31 = vector.shape_cast %30 : vector<1x32x55xf32> to vector<32x55xf32>
    %32 = arith.truncf %31 : vector<32x55xf32> to vector<32x55xbf16>
    %c96_28 = arith.constant 96 : index
    %c73 = arith.constant 73 : index
    %33 = vector.load %arg9[%c96_28, %c73] : memref<800x128xbf16, #tpu.memory_space<vmem>>, vector<32x55xbf16>
    tpu.vector_store %arg9[%c96_28, %c73], %32 {strides = array<i32>} : memref<800x128xbf16, #tpu.memory_space<vmem>>, vector<32x55xbf16>,
    %c0_29 = arith.constant 0 : index
    %c0_30 = arith.constant 0 : index
    %c0_31 = arith.constant 0 : index
    %34 = vector.load %arg1[%c0_29, %c0_30, %c0_31] : memref<2x32x64xf32, #tpu.memory_space<vmem>>, vector<1x32x56xf32>
    %35 = vector.shape_cast %34 : vector<1x32x56xf32> to vector<32x56xf32>
    %36 = arith.truncf %35 : vector<32x56xf32> to vector<32x56xbf16>
    %c128 = arith.constant 128 : index
    %c8 = arith.constant 8 : index
    %37 = vector.load %arg9[%c128, %c8] : memref<800x128xbf16, #tpu.memory_space<vmem>>, vector<32x56xbf16>
    tpu.vector_store %arg9[%c128, %c8], %36 {strides = array<i32>} : memref<800x128xbf16, #tpu.memory_space<vmem>>, vector<32x56xbf16>,
    %c1_32 = arith.constant 1 : index
    %c0_33 = arith.constant 0 : index
    %c0_34 = arith.constant 0 : index
    %38 = vector.load %arg1[%c1_32, %c0_33, %c0_34] : memref<2x32x64xf32, #tpu.memory_space<vmem>>, vector<1x32x56xf32>
    %39 = vector.shape_cast %38 : vector<1x32x56xf32> to vector<32x56xf32>
    %40 = arith.truncf %39 : vector<32x56xf32> to vector<32x56xbf16>
    %c128_35 = arith.constant 128 : index
    %c72 = arith.constant 72 : index
    %41 = vector.load %arg9[%c128_35, %c72] : memref<800x128xbf16, #tpu.memory_space<vmem>>, vector<32x56xbf16>
    tpu.vector_store %arg9[%c128_35, %c72], %40 {strides = array<i32>} : memref<800x128xbf16, #tpu.memory_space<vmem>>, vector<32x56xbf16>,
    %c0_36 = arith.constant 0 : index
    %c0_37 = arith.constant 0 : index
    %c0_38 = arith.constant 0 : index
    %42 = vector.load %arg1[%c0_36, %c0_37, %c0_38] : memref<2x32x64xf32, #tpu.memory_space<vmem>>, vector<1x32x57xf32>
    %43 = vector.shape_cast %42 : vector<1x32x57xf32> to vector<32x57xf32>
    %44 = arith.truncf %43 : vector<32x57xf32> to vector<32x57xbf16>
    %c160 = arith.constant 160 : index
    %c7 = arith.constant 7 : index
    %45 = vector.load %arg9[%c160, %c7] : memref<800x128xbf16, #tpu.memory_space<vmem>>, vector<32x57xbf16>
    tpu.vector_store %arg9[%c160, %c7], %44 {strides = array<i32>} : memref<800x128xbf16, #tpu.memory_space<vmem>>, vector<32x57xbf16>,
    %c1_39 = arith.constant 1 : index
    %c0_40 = arith.constant 0 : index
    %c0_41 = arith.constant 0 : index
    %46 = vector.load %arg1[%c1_39, %c0_40, %c0_41] : memref<2x32x64xf32, #tpu.memory_space<vmem>>, vector<1x32x57xf32>
    %47 = vector.shape_cast %46 : vector<1x32x57xf32> to vector<32x57xf32>
    %48 = arith.truncf %47 : vector<32x57xf32> to vector<32x57xbf16>
    %c160_42 = arith.constant 160 : index
    %c71 = arith.constant 71 : index
    %49 = vector.load %arg9[%c160_42, %c71] : memref<800x128xbf16, #tpu.memory_space<vmem>>, vector<32x57xbf16>
    tpu.vector_store %arg9[%c160_42, %c71], %48 {strides = array<i32>} : memref<800x128xbf16, #tpu.memory_space<vmem>>, vector<32x57xbf16>,
    %c0_43 = arith.constant 0 : index
    %c0_44 = arith.constant 0 : index
    %c0_45 = arith.constant 0 : index
    %50 = vector.load %arg1[%c0_43, %c0_44, %c0_45] : memref<2x32x64xf32, #tpu.memory_space<vmem>>, vector<1x32x58xf32>
    %51 = vector.shape_cast %50 : vector<1x32x58xf32> to vector<32x58xf32>
    %52 = arith.truncf %51 : vector<32x58xf32> to vector<32x58xbf16>
    %c192 = arith.constant 192 : index
    %c6 = arith.constant 6 : index
    %53 = vector.load %arg9[%c192, %c6] : memref<800x128xbf16, #tpu.memory_space<vmem>>, vector<32x58xbf16>
    tpu.vector_store %arg9[%c192, %c6], %52 {strides = array<i32>} : memref<800x128xbf16, #tpu.memory_space<vmem>>, vector<32x58xbf16>,
    %c1_46 = arith.constant 1 : index
    %c0_47 = arith.constant 0 : index
    %c0_48 = arith.constant 0 : index
    %54 = vector.load %arg1[%c1_46, %c0_47, %c0_48] : memref<2x32x64xf32, #tpu.memory_space<vmem>>, vector<1x32x58xf32>
    %55 = vector.shape_cast %54 : vector<1x32x58xf32> to vector<32x58xf32>
    %56 = arith.truncf %55 : vector<32x58xf32> to vector<32x58xbf16>
    %c192_49 = arith.constant 192 : index
    %c70 = arith.constant 70 : index
    %57 = vector.load %arg9[%c192_49, %c70] : memref<800x128xbf16, #tpu.memory_space<vmem>>, vector<32x58xbf16>
    tpu.vector_store %arg9[%c192_49, %c70], %56 {strides = array<i32>} : memref<800x128xbf16, #tpu.memory_space<vmem>>, vector<32x58xbf16>,
    %c0_50 = arith.constant 0 : index
    %c0_51 = arith.constant 0 : index
    %c0_52 = arith.constant 0 : index
    %58 = vector.load %arg1[%c0_50, %c0_51, %c0_52] : memref<2x32x64xf32, #tpu.memory_space<vmem>>, vector<1x32x59xf32>
    %59 = vector.shape_cast %58 : vector<1x32x59xf32> to vector<32x59xf32>
    %60 = arith.truncf %59 : vector<32x59xf32> to vector<32x59xbf16>
    %c224 = arith.constant 224 : index
    %c5 = arith.constant 5 : index
    %61 = vector.load %arg9[%c224, %c5] : memref<800x128xbf16, #tpu.memory_space<vmem>>, vector<32x59xbf16>
    tpu.vector_store %arg9[%c224, %c5], %60 {strides = array<i32>} : memref<800x128xbf16, #tpu.memory_space<vmem>>, vector<32x59xbf16>,
    %c1_53 = arith.constant 1 : index
    %c0_54 = arith.constant 0 : index
    %c0_55 = arith.constant 0 : index
    %62 = vector.load %arg1[%c1_53, %c0_54, %c0_55] : memref<2x32x64xf32, #tpu.memory_space<vmem>>, vector<1x32x59xf32>
    %63 = vector.shape_cast %62 : vector<1x32x59xf32> to vector<32x59xf32>
    %64 = arith.truncf %63 : vector<32x59xf32> to vector<32x59xbf16>
    %c224_56 = arith.constant 224 : index
    %c69 = arith.constant 69 : index
    %65 = vector.load %arg9[%c224_56, %c69] : memref<800x128xbf16, #tpu.memory_space<vmem>>, vector<32x59xbf16>
    tpu.vector_store %arg9[%c224_56, %c69], %64 {strides = array<i32>} : memref<800x128xbf16, #tpu.memory_space<vmem>>, vector<32x59xbf16>,
    %c0_57 = arith.constant 0 : index
    %c0_58 = arith.constant 0 : index
    %c0_59 = arith.constant 0 : index
    %66 = vector.load %arg1[%c0_57, %c0_58, %c0_59] : memref<2x32x64xf32, #tpu.memory_space<vmem>>, vector<1x32x60xf32>
    %67 = vector.shape_cast %66 : vector<1x32x60xf32> to vector<32x60xf32>
    %68 = arith.truncf %67 : vector<32x60xf32> to vector<32x60xbf16>
    %c256 = arith.constant 256 : index
    %c4 = arith.constant 4 : index
    %69 = vector.load %arg9[%c256, %c4] : memref<800x128xbf16, #tpu.memory_space<vmem>>, vector<32x60xbf16>
    tpu.vector_store %arg9[%c256, %c4], %68 {strides = array<i32>} : memref<800x128xbf16, #tpu.memory_space<vmem>>, vector<32x60xbf16>,
    %c1_60 = arith.constant 1 : index
    %c0_61 = arith.constant 0 : index
    %c0_62 = arith.constant 0 : index
    %70 = vector.load %arg1[%c1_60, %c0_61, %c0_62] : memref<2x32x64xf32, #tpu.memory_space<vmem>>, vector<1x32x60xf32>
    %71 = vector.shape_cast %70 : vector<1x32x60xf32> to vector<32x60xf32>
    %72 = arith.truncf %71 : vector<32x60xf32> to vector<32x60xbf16>
    %c256_63 = arith.constant 256 : index
    %c68 = arith.constant 68 : index
    %73 = vector.load %arg9[%c256_63, %c68] : memref<800x128xbf16, #tpu.memory_space<vmem>>, vector<32x60xbf16>
    tpu.vector_store %arg9[%c256_63, %c68], %72 {strides = array<i32>} : memref<800x128xbf16, #tpu.memory_space<vmem>>, vector<32x60xbf16>,
    %c0_64 = arith.constant 0 : index
    %c0_65 = arith.constant 0 : index
    %c0_66 = arith.constant 0 : index
    %74 = vector.load %arg1[%c0_64, %c0_65, %c0_66] : memref<2x32x64xf32, #tpu.memory_space<vmem>>, vector<1x32x61xf32>
    %75 = vector.shape_cast %74 : vector<1x32x61xf32> to vector<32x61xf32>
    %76 = arith.truncf %75 : vector<32x61xf32> to vector<32x61xbf16>
    %c288 = arith.constant 288 : index
    %c3 = arith.constant 3 : index
    %77 = vector.load %arg9[%c288, %c3] : memref<800x128xbf16, #tpu.memory_space<vmem>>, vector<32x61xbf16>
    tpu.vector_store %arg9[%c288, %c3], %76 {strides = array<i32>} : memref<800x128xbf16, #tpu.memory_space<vmem>>, vector<32x61xbf16>,
    %c1_67 = arith.constant 1 : index
    %c0_68 = arith.constant 0 : index
    %c0_69 = arith.constant 0 : index
    %78 = vector.load %arg1[%c1_67, %c0_68, %c0_69] : memref<2x32x64xf32, #tpu.memory_space<vmem>>, vector<1x32x61xf32>
    %79 = vector.shape_cast %78 : vector<1x32x61xf32> to vector<32x61xf32>
    %80 = arith.truncf %79 : vector<32x61xf32> to vector<32x61xbf16>
    %c288_70 = arith.constant 288 : index
    %c67 = arith.constant 67 : index
    %81 = vector.load %arg9[%c288_70, %c67] : memref<800x128xbf16, #tpu.memory_space<vmem>>, vector<32x61xbf16>
    tpu.vector_store %arg9[%c288_70, %c67], %80 {strides = array<i32>} : memref<800x128xbf16, #tpu.memory_space<vmem>>, vector<32x61xbf16>,
    %c0_71 = arith.constant 0 : index
    %c0_72 = arith.constant 0 : index
    %c0_73 = arith.constant 0 : index
    %82 = vector.load %arg1[%c0_71, %c0_72, %c0_73] : memref<2x32x64xf32, #tpu.memory_space<vmem>>, vector<1x32x62xf32>
    %83 = vector.shape_cast %82 : vector<1x32x62xf32> to vector<32x62xf32>
    %84 = arith.truncf %83 : vector<32x62xf32> to vector<32x62xbf16>
    %c320 = arith.constant 320 : index
    %c2 = arith.constant 2 : index
    %85 = vector.load %arg9[%c320, %c2] : memref<800x128xbf16, #tpu.memory_space<vmem>>, vector<32x62xbf16>
    tpu.vector_store %arg9[%c320, %c2], %84 {strides = array<i32>} : memref<800x128xbf16, #tpu.memory_space<vmem>>, vector<32x62xbf16>,
    %c1_74 = arith.constant 1 : index
    %c0_75 = arith.constant 0 : index
    %c0_76 = arith.constant 0 : index
    %86 = vector.load %arg1[%c1_74, %c0_75, %c0_76] : memref<2x32x64xf32, #tpu.memory_space<vmem>>, vector<1x32x62xf32>
    %87 = vector.shape_cast %86 : vector<1x32x62xf32> to vector<32x62xf32>
    %88 = arith.truncf %87 : vector<32x62xf32> to vector<32x62xbf16>
    %c320_77 = arith.constant 320 : index
    %c66 = arith.constant 66 : index
    %89 = vector.load %arg9[%c320_77, %c66] : memref<800x128xbf16, #tpu.memory_space<vmem>>, vector<32x62xbf16>
    tpu.vector_store %arg9[%c320_77, %c66], %88 {strides = array<i32>} : memref<800x128xbf16, #tpu.memory_space<vmem>>, vector<32x62xbf16>,
    %c0_78 = arith.constant 0 : index
    %c0_79 = arith.constant 0 : index
    %c0_80 = arith.constant 0 : index
    %90 = vector.load %arg1[%c0_78, %c0_79, %c0_80] : memref<2x32x64xf32, #tpu.memory_space<vmem>>, vector<1x32x63xf32>
    %91 = vector.shape_cast %90 : vector<1x32x63xf32> to vector<32x63xf32>
    %92 = arith.truncf %91 : vector<32x63xf32> to vector<32x63xbf16>
    %c352 = arith.constant 352 : index
    %c1_81 = arith.constant 1 : index
    %93 = vector.load %arg9[%c352, %c1_81] : memref<800x128xbf16, #tpu.memory_space<vmem>>, vector<32x63xbf16>
    tpu.vector_store %arg9[%c352, %c1_81], %92 {strides = array<i32>} : memref<800x128xbf16, #tpu.memory_space<vmem>>, vector<32x63xbf16>,
    %c1_82 = arith.constant 1 : index
    %c0_83 = arith.constant 0 : index
    %c0_84 = arith.constant 0 : index
    %94 = vector.load %arg1[%c1_82, %c0_83, %c0_84] : memref<2x32x64xf32, #tpu.memory_space<vmem>>, vector<1x32x63xf32>
    %95 = vector.shape_cast %94 : vector<1x32x63xf32> to vector<32x63xf32>
    %96 = arith.truncf %95 : vector<32x63xf32> to vector<32x63xbf16>
    %c352_85 = arith.constant 352 : index
    %c65 = arith.constant 65 : index
    %97 = vector.load %arg9[%c352_85, %c65] : memref<800x128xbf16, #tpu.memory_space<vmem>>, vector<32x63xbf16>
    tpu.vector_store %arg9[%c352_85, %c65], %96 {strides = array<i32>} : memref<800x128xbf16, #tpu.memory_space<vmem>>, vector<32x63xbf16>,
    %c0_86 = arith.constant 0 : index
    %c0_87 = arith.constant 0 : index
    %c0_88 = arith.constant 0 : index
    %98 = vector.load %arg1[%c0_86, %c0_87, %c0_88] : memref<2x32x64xf32, #tpu.memory_space<vmem>>, vector<1x32x64xf32>
    %99 = vector.shape_cast %98 : vector<1x32x64xf32> to vector<32x64xf32>
    %100 = arith.truncf %99 : vector<32x64xf32> to vector<32x64xbf16>
    %c384 = arith.constant 384 : index
    %c0_89 = arith.constant 0 : index
    %101 = vector.load %arg9[%c384, %c0_89] : memref<800x128xbf16, #tpu.memory_space<vmem>>, vector<32x64xbf16>
    tpu.vector_store %arg9[%c384, %c0_89], %100 {strides = array<i32>} : memref<800x128xbf16, #tpu.memory_space<vmem>>, vector<32x64xbf16>,
    %c1_90 = arith.constant 1 : index
    %c0_91 = arith.constant 0 : index
    %c0_92 = arith.constant 0 : index
    %102 = vector.load %arg1[%c1_90, %c0_91, %c0_92] : memref<2x32x64xf32, #tpu.memory_space<vmem>>, vector<1x32x64xf32>
    %103 = vector.shape_cast %102 : vector<1x32x64xf32> to vector<32x64xf32>
    %104 = arith.truncf %103 : vector<32x64xf32> to vector<32x64xbf16>
    %c384_93 = arith.constant 384 : index
    %c64_94 = arith.constant 64 : index
    %105 = vector.load %arg9[%c384_93, %c64_94] : memref<800x128xbf16, #tpu.memory_space<vmem>>, vector<32x64xbf16>
    tpu.vector_store %arg9[%c384_93, %c64_94], %104 {strides = array<i32>} : memref<800x128xbf16, #tpu.memory_space<vmem>>, vector<32x64xbf16>,
    %c0_95 = arith.constant 0 : index
    %c0_96 = arith.constant 0 : index
    %c1_97 = arith.constant 1 : index
    %106 = vector.load %arg1[%c0_95, %c0_96, %c1_97] : memref<2x32x64xf32, #tpu.memory_space<vmem>>, vector<1x32x63xf32>
    %107 = vector.shape_cast %106 : vector<1x32x63xf32> to vector<32x63xf32>
    %108 = arith.truncf %107 : vector<32x63xf32> to vector<32x63xbf16>
    %c416 = arith.constant 416 : index
    %c0_98 = arith.constant 0 : index
    %109 = vector.load %arg9[%c416, %c0_98] : memref<800x128xbf16, #tpu.memory_space<vmem>>, vector<32x63xbf16>
    tpu.vector_store %arg9[%c416, %c0_98], %108 {strides = array<i32>} : memref<800x128xbf16, #tpu.memory_space<vmem>>, vector<32x63xbf16>,
    %c1_99 = arith.constant 1 : index
    %c0_100 = arith.constant 0 : index
    %c1_101 = arith.constant 1 : index
    %110 = vector.load %arg1[%c1_99, %c0_100, %c1_101] : memref<2x32x64xf32, #tpu.memory_space<vmem>>, vector<1x32x63xf32>
    %111 = vector.shape_cast %110 : vector<1x32x63xf32> to vector<32x63xf32>
    %112 = arith.truncf %111 : vector<32x63xf32> to vector<32x63xbf16>
    %c416_102 = arith.constant 416 : index
    %c64_103 = arith.constant 64 : index
    %113 = vector.load %arg9[%c416_102, %c64_103] : memref<800x128xbf16, #tpu.memory_space<vmem>>, vector<32x63xbf16>
    tpu.vector_store %arg9[%c416_102, %c64_103], %112 {strides = array<i32>} : memref<800x128xbf16, #tpu.memory_space<vmem>>, vector<32x63xbf16>,
    %c0_104 = arith.constant 0 : index
    %c0_105 = arith.constant 0 : index
    %c2_106 = arith.constant 2 : index
    %114 = vector.load %arg1[%c0_104, %c0_105, %c2_106] : memref<2x32x64xf32, #tpu.memory_space<vmem>>, vector<1x32x62xf32>
    %115 = vector.shape_cast %114 : vector<1x32x62xf32> to vector<32x62xf32>
    %116 = arith.truncf %115 : vector<32x62xf32> to vector<32x62xbf16>
    %c448 = arith.constant 448 : index
    %c0_107 = arith.constant 0 : index
    %117 = vector.load %arg9[%c448, %c0_107] : memref<800x128xbf16, #tpu.memory_space<vmem>>, vector<32x62xbf16>
    tpu.vector_store %arg9[%c448, %c0_107], %116 {strides = array<i32>} : memref<800x128xbf16, #tpu.memory_space<vmem>>, vector<32x62xbf16>,
    %c1_108 = arith.constant 1 : index
    %c0_109 = arith.constant 0 : index
    %c2_110 = arith.constant 2 : index
    %118 = vector.load %arg1[%c1_108, %c0_109, %c2_110] : memref<2x32x64xf32, #tpu.memory_space<vmem>>, vector<1x32x62xf32>
    %119 = vector.shape_cast %118 : vector<1x32x62xf32> to vector<32x62xf32>
    %120 = arith.truncf %119 : vector<32x62xf32> to vector<32x62xbf16>
    %c448_111 = arith.constant 448 : index
    %c64_112 = arith.constant 64 : index
    %121 = vector.load %arg9[%c448_111, %c64_112] : memref<800x128xbf16, #tpu.memory_space<vmem>>, vector<32x62xbf16>
    tpu.vector_store %arg9[%c448_111, %c64_112], %120 {strides = array<i32>} : memref<800x128xbf16, #tpu.memory_space<vmem>>, vector<32x62xbf16>,
    %c0_113 = arith.constant 0 : index
    %c0_114 = arith.constant 0 : index
    %c3_115 = arith.constant 3 : index
    %122 = vector.load %arg1[%c0_113, %c0_114, %c3_115] : memref<2x32x64xf32, #tpu.memory_space<vmem>>, vector<1x32x61xf32>
    %123 = vector.shape_cast %122 : vector<1x32x61xf32> to vector<32x61xf32>
    %124 = arith.truncf %123 : vector<32x61xf32> to vector<32x61xbf16>
    %c480 = arith.constant 480 : index
    %c0_116 = arith.constant 0 : index
    %125 = vector.load %arg9[%c480, %c0_116] : memref<800x128xbf16, #tpu.memory_space<vmem>>, vector<32x61xbf16>
    tpu.vector_store %arg9[%c480, %c0_116], %124 {strides = array<i32>} : memref<800x128xbf16, #tpu.memory_space<vmem>>, vector<32x61xbf16>,
    %c1_117 = arith.constant 1 : index
    %c0_118 = arith.constant 0 : index
    %c3_119 = arith.constant 3 : index
    %126 = vector.load %arg1[%c1_117, %c0_118, %c3_119] : memref<2x32x64xf32, #tpu.memory_space<vmem>>, vector<1x32x61xf32>
    %127 = vector.shape_cast %126 : vector<1x32x61xf32> to vector<32x61xf32>
    %128 = arith.truncf %127 : vector<32x61xf32> to vector<32x61xbf16>
    %c480_120 = arith.constant 480 : index
    %c64_121 = arith.constant 64 : index
    %129 = vector.load %arg9[%c480_120, %c64_121] : memref<800x128xbf16, #tpu.memory_space<vmem>>, vector<32x61xbf16>
    tpu.vector_store %arg9[%c480_120, %c64_121], %128 {strides = array<i32>} : memref<800x128xbf16, #tpu.memory_space<vmem>>, vector<32x61xbf16>,
    %c0_122 = arith.constant 0 : index
    %c0_123 = arith.constant 0 : index
    %c4_124 = arith.constant 4 : index
    %130 = vector.load %arg1[%c0_122, %c0_123, %c4_124] : memref<2x32x64xf32, #tpu.memory_space<vmem>>, vector<1x32x60xf32>
    %131 = vector.shape_cast %130 : vector<1x32x60xf32> to vector<32x60xf32>
    %132 = arith.truncf %131 : vector<32x60xf32> to vector<32x60xbf16>
    %c512 = arith.constant 512 : index
    %c0_125 = arith.constant 0 : index
    %133 = vector.load %arg9[%c512, %c0_125] : memref<800x128xbf16, #tpu.memory_space<vmem>>, vector<32x60xbf16>
    tpu.vector_store %arg9[%c512, %c0_125], %132 {strides = array<i32>} : memref<800x128xbf16, #tpu.memory_space<vmem>>, vector<32x60xbf16>,
    %c1_126 = arith.constant 1 : index
    %c0_127 = arith.constant 0 : index
    %c4_128 = arith.constant 4 : index
    %134 = vector.load %arg1[%c1_126, %c0_127, %c4_128] : memref<2x32x64xf32, #tpu.memory_space<vmem>>, vector<1x32x60xf32>
    %135 = vector.shape_cast %134 : vector<1x32x60xf32> to vector<32x60xf32>
    %136 = arith.truncf %135 : vector<32x60xf32> to vector<32x60xbf16>
    %c512_129 = arith.constant 512 : index
    %c64_130 = arith.constant 64 : index
    %137 = vector.load %arg9[%c512_129, %c64_130] : memref<800x128xbf16, #tpu.memory_space<vmem>>, vector<32x60xbf16>
    tpu.vector_store %arg9[%c512_129, %c64_130], %136 {strides = array<i32>} : memref<800x128xbf16, #tpu.memory_space<vmem>>, vector<32x60xbf16>,
    %c0_131 = arith.constant 0 : index
    %c0_132 = arith.constant 0 : index
    %c5_133 = arith.constant 5 : index
    %138 = vector.load %arg1[%c0_131, %c0_132, %c5_133] : memref<2x32x64xf32, #tpu.memory_space<vmem>>, vector<1x32x59xf32>
    %139 = vector.shape_cast %138 : vector<1x32x59xf32> to vector<32x59xf32>
    %140 = arith.truncf %139 : vector<32x59xf32> to vector<32x59xbf16>
    %c544 = arith.constant 544 : index
    %c0_134 = arith.constant 0 : index
    %141 = vector.load %arg9[%c544, %c0_134] : memref<800x128xbf16, #tpu.memory_space<vmem>>, vector<32x59xbf16>
    tpu.vector_store %arg9[%c544, %c0_134], %140 {strides = array<i32>} : memref<800x128xbf16, #tpu.memory_space<vmem>>, vector<32x59xbf16>,
    %c1_135 = arith.constant 1 : index
    %c0_136 = arith.constant 0 : index
    %c5_137 = arith.constant 5 : index
    %142 = vector.load %arg1[%c1_135, %c0_136, %c5_137] : memref<2x32x64xf32, #tpu.memory_space<vmem>>, vector<1x32x59xf32>
    %143 = vector.shape_cast %142 : vector<1x32x59xf32> to vector<32x59xf32>
    %144 = arith.truncf %143 : vector<32x59xf32> to vector<32x59xbf16>
    %c544_138 = arith.constant 544 : index
    %c64_139 = arith.constant 64 : index
    %145 = vector.load %arg9[%c544_138, %c64_139] : memref<800x128xbf16, #tpu.memory_space<vmem>>, vector<32x59xbf16>
    tpu.vector_store %arg9[%c544_138, %c64_139], %144 {strides = array<i32>} : memref<800x128xbf16, #tpu.memory_space<vmem>>, vector<32x59xbf16>,
    %c0_140 = arith.constant 0 : index
    %c0_141 = arith.constant 0 : index
    %c6_142 = arith.constant 6 : index
    %146 = vector.load %arg1[%c0_140, %c0_141, %c6_142] : memref<2x32x64xf32, #tpu.memory_space<vmem>>, vector<1x32x58xf32>
    %147 = vector.shape_cast %146 : vector<1x32x58xf32> to vector<32x58xf32>
    %148 = arith.truncf %147 : vector<32x58xf32> to vector<32x58xbf16>
    %c576 = arith.constant 576 : index
    %c0_143 = arith.constant 0 : index
    %149 = vector.load %arg9[%c576, %c0_143] : memref<800x128xbf16, #tpu.memory_space<vmem>>, vector<32x58xbf16>
    tpu.vector_store %arg9[%c576, %c0_143], %148 {strides = array<i32>} : memref<800x128xbf16, #tpu.memory_space<vmem>>, vector<32x58xbf16>,
    %c1_144 = arith.constant 1 : index
    %c0_145 = arith.constant 0 : index
    %c6_146 = arith.constant 6 : index
    %150 = vector.load %arg1[%c1_144, %c0_145, %c6_146] : memref<2x32x64xf32, #tpu.memory_space<vmem>>, vector<1x32x58xf32>
    %151 = vector.shape_cast %150 : vector<1x32x58xf32> to vector<32x58xf32>
    %152 = arith.truncf %151 : vector<32x58xf32> to vector<32x58xbf16>
    %c576_147 = arith.constant 576 : index
    %c64_148 = arith.constant 64 : index
    %153 = vector.load %arg9[%c576_147, %c64_148] : memref<800x128xbf16, #tpu.memory_space<vmem>>, vector<32x58xbf16>
    tpu.vector_store %arg9[%c576_147, %c64_148], %152 {strides = array<i32>} : memref<800x128xbf16, #tpu.memory_space<vmem>>, vector<32x58xbf16>,
    %c0_149 = arith.constant 0 : index
    %c0_150 = arith.constant 0 : index
    %c7_151 = arith.constant 7 : index
    %154 = vector.load %arg1[%c0_149, %c0_150, %c7_151] : memref<2x32x64xf32, #tpu.memory_space<vmem>>, vector<1x32x57xf32>
    %155 = vector.shape_cast %154 : vector<1x32x57xf32> to vector<32x57xf32>
    %156 = arith.truncf %155 : vector<32x57xf32> to vector<32x57xbf16>
    %c608 = arith.constant 608 : index
    %c0_152 = arith.constant 0 : index
    %157 = vector.load %arg9[%c608, %c0_152] : memref<800x128xbf16, #tpu.memory_space<vmem>>, vector<32x57xbf16>
    tpu.vector_store %arg9[%c608, %c0_152], %156 {strides = array<i32>} : memref<800x128xbf16, #tpu.memory_space<vmem>>, vector<32x57xbf16>,
    %c1_153 = arith.constant 1 : index
    %c0_154 = arith.constant 0 : index
    %c7_155 = arith.constant 7 : index
    %158 = vector.load %arg1[%c1_153, %c0_154, %c7_155] : memref<2x32x64xf32, #tpu.memory_space<vmem>>, vector<1x32x57xf32>
    %159 = vector.shape_cast %158 : vector<1x32x57xf32> to vector<32x57xf32>
    %160 = arith.truncf %159 : vector<32x57xf32> to vector<32x57xbf16>
    %c608_156 = arith.constant 608 : index
    %c64_157 = arith.constant 64 : index
    %161 = vector.load %arg9[%c608_156, %c64_157] : memref<800x128xbf16, #tpu.memory_space<vmem>>, vector<32x57xbf16>
    tpu.vector_store %arg9[%c608_156, %c64_157], %160 {strides = array<i32>} : memref<800x128xbf16, #tpu.memory_space<vmem>>, vector<32x57xbf16>,
    %c0_158 = arith.constant 0 : index
    %c0_159 = arith.constant 0 : index
    %c8_160 = arith.constant 8 : index
    %162 = vector.load %arg1[%c0_158, %c0_159, %c8_160] : memref<2x32x64xf32, #tpu.memory_space<vmem>>, vector<1x32x56xf32>
    %163 = vector.shape_cast %162 : vector<1x32x56xf32> to vector<32x56xf32>
    %164 = arith.truncf %163 : vector<32x56xf32> to vector<32x56xbf16>
    %c640 = arith.constant 640 : index
    %c0_161 = arith.constant 0 : index
    %165 = vector.load %arg9[%c640, %c0_161] : memref<800x128xbf16, #tpu.memory_space<vmem>>, vector<32x56xbf16>
    tpu.vector_store %arg9[%c640, %c0_161], %164 {strides = array<i32>} : memref<800x128xbf16, #tpu.memory_space<vmem>>, vector<32x56xbf16>,
    %c1_162 = arith.constant 1 : index
    %c0_163 = arith.constant 0 : index
    %c8_164 = arith.constant 8 : index
    %166 = vector.load %arg1[%c1_162, %c0_163, %c8_164] : memref<2x32x64xf32, #tpu.memory_space<vmem>>, vector<1x32x56xf32>
    %167 = vector.shape_cast %166 : vector<1x32x56xf32> to vector<32x56xf32>
    %168 = arith.truncf %167 : vector<32x56xf32> to vector<32x56xbf16>
    %c640_165 = arith.constant 640 : index
    %c64_166 = arith.constant 64 : index
    %169 = vector.load %arg9[%c640_165, %c64_166] : memref<800x128xbf16, #tpu.memory_space<vmem>>, vector<32x56xbf16>
    tpu.vector_store %arg9[%c640_165, %c64_166], %168 {strides = array<i32>} : memref<800x128xbf16, #tpu.memory_space<vmem>>, vector<32x56xbf16>,
    %c0_167 = arith.constant 0 : index
    %c0_168 = arith.constant 0 : index
    %c9_169 = arith.constant 9 : index
    %170 = vector.load %arg1[%c0_167, %c0_168, %c9_169] : memref<2x32x64xf32, #tpu.memory_space<vmem>>, vector<1x32x55xf32>
    %171 = vector.shape_cast %170 : vector<1x32x55xf32> to vector<32x55xf32>
    %172 = arith.truncf %171 : vector<32x55xf32> to vector<32x55xbf16>
    %c672 = arith.constant 672 : index
    %c0_170 = arith.constant 0 : index
    %173 = vector.load %arg9[%c672, %c0_170] : memref<800x128xbf16, #tpu.memory_space<vmem>>, vector<32x55xbf16>
    tpu.vector_store %arg9[%c672, %c0_170], %172 {strides = array<i32>} : memref<800x128xbf16, #tpu.memory_space<vmem>>, vector<32x55xbf16>,
    %c1_171 = arith.constant 1 : index
    %c0_172 = arith.constant 0 : index
    %c9_173 = arith.constant 9 : index
    %174 = vector.load %arg1[%c1_171, %c0_172, %c9_173] : memref<2x32x64xf32, #tpu.memory_space<vmem>>, vector<1x32x55xf32>
    %175 = vector.shape_cast %174 : vector<1x32x55xf32> to vector<32x55xf32>
    %176 = arith.truncf %175 : vector<32x55xf32> to vector<32x55xbf16>
    %c672_174 = arith.constant 672 : index
    %c64_175 = arith.constant 64 : index
    %177 = vector.load %arg9[%c672_174, %c64_175] : memref<800x128xbf16, #tpu.memory_space<vmem>>, vector<32x55xbf16>
    tpu.vector_store %arg9[%c672_174, %c64_175], %176 {strides = array<i32>} : memref<800x128xbf16, #tpu.memory_space<vmem>>, vector<32x55xbf16>,
    %c0_176 = arith.constant 0 : index
    %c0_177 = arith.constant 0 : index
    %c10_178 = arith.constant 10 : index
    %178 = vector.load %arg1[%c0_176, %c0_177, %c10_178] : memref<2x32x64xf32, #tpu.memory_space<vmem>>, vector<1x32x54xf32>
    %179 = vector.shape_cast %178 : vector<1x32x54xf32> to vector<32x54xf32>
    %180 = arith.truncf %179 : vector<32x54xf32> to vector<32x54xbf16>
    %c704 = arith.constant 704 : index
    %c0_179 = arith.constant 0 : index
    %181 = vector.load %arg9[%c704, %c0_179] : memref<800x128xbf16, #tpu.memory_space<vmem>>, vector<32x54xbf16>
    tpu.vector_store %arg9[%c704, %c0_179], %180 {strides = array<i32>} : memref<800x128xbf16, #tpu.memory_space<vmem>>, vector<32x54xbf16>,
    %c1_180 = arith.constant 1 : index
    %c0_181 = arith.constant 0 : index
    %c10_182 = arith.constant 10 : index
    %182 = vector.load %arg1[%c1_180, %c0_181, %c10_182] : memref<2x32x64xf32, #tpu.memory_space<vmem>>, vector<1x32x54xf32>
    %183 = vector.shape_cast %182 : vector<1x32x54xf32> to vector<32x54xf32>
    %184 = arith.truncf %183 : vector<32x54xf32> to vector<32x54xbf16>
    %c704_183 = arith.constant 704 : index
    %c64_184 = arith.constant 64 : index
    %185 = vector.load %arg9[%c704_183, %c64_184] : memref<800x128xbf16, #tpu.memory_space<vmem>>, vector<32x54xbf16>
    tpu.vector_store %arg9[%c704_183, %c64_184], %184 {strides = array<i32>} : memref<800x128xbf16, #tpu.memory_space<vmem>>, vector<32x54xbf16>,
    %c0_185 = arith.constant 0 : index
    %c0_186 = arith.constant 0 : index
    %c11_187 = arith.constant 11 : index
    %186 = vector.load %arg1[%c0_185, %c0_186, %c11_187] : memref<2x32x64xf32, #tpu.memory_space<vmem>>, vector<1x32x53xf32>
    %187 = vector.shape_cast %186 : vector<1x32x53xf32> to vector<32x53xf32>
    %188 = arith.truncf %187 : vector<32x53xf32> to vector<32x53xbf16>
    %c736 = arith.constant 736 : index
    %c0_188 = arith.constant 0 : index
    %189 = vector.load %arg9[%c736, %c0_188] : memref<800x128xbf16, #tpu.memory_space<vmem>>, vector<32x53xbf16>
    tpu.vector_store %arg9[%c736, %c0_188], %188 {strides = array<i32>} : memref<800x128xbf16, #tpu.memory_space<vmem>>, vector<32x53xbf16>,
    %c1_189 = arith.constant 1 : index
    %c0_190 = arith.constant 0 : index
    %c11_191 = arith.constant 11 : index
    %190 = vector.load %arg1[%c1_189, %c0_190, %c11_191] : memref<2x32x64xf32, #tpu.memory_space<vmem>>, vector<1x32x53xf32>
    %191 = vector.shape_cast %190 : vector<1x32x53xf32> to vector<32x53xf32>
    %192 = arith.truncf %191 : vector<32x53xf32> to vector<32x53xbf16>
    %c736_192 = arith.constant 736 : index
    %c64_193 = arith.constant 64 : index
    %193 = vector.load %arg9[%c736_192, %c64_193] : memref<800x128xbf16, #tpu.memory_space<vmem>>, vector<32x53xbf16>
    tpu.vector_store %arg9[%c736_192, %c64_193], %192 {strides = array<i32>} : memref<800x128xbf16, #tpu.memory_space<vmem>>, vector<32x53xbf16>,
    %c0_194 = arith.constant 0 : index
    %c0_195 = arith.constant 0 : index
    %c12_196 = arith.constant 12 : index
    %194 = vector.load %arg1[%c0_194, %c0_195, %c12_196] : memref<2x32x64xf32, #tpu.memory_space<vmem>>, vector<1x32x52xf32>
    %195 = vector.shape_cast %194 : vector<1x32x52xf32> to vector<32x52xf32>
    %196 = arith.truncf %195 : vector<32x52xf32> to vector<32x52xbf16>
    %c768 = arith.constant 768 : index
    %c0_197 = arith.constant 0 : index
    %197 = vector.load %arg9[%c768, %c0_197] : memref<800x128xbf16, #tpu.memory_space<vmem>>, vector<32x52xbf16>
    tpu.vector_store %arg9[%c768, %c0_197], %196 {strides = array<i32>} : memref<800x128xbf16, #tpu.memory_space<vmem>>, vector<32x52xbf16>,
    %c1_198 = arith.constant 1 : index
    %c0_199 = arith.constant 0 : index
    %c12_200 = arith.constant 12 : index
    %198 = vector.load %arg1[%c1_198, %c0_199, %c12_200] : memref<2x32x64xf32, #tpu.memory_space<vmem>>, vector<1x32x52xf32>
    %199 = vector.shape_cast %198 : vector<1x32x52xf32> to vector<32x52xf32>
    %200 = arith.truncf %199 : vector<32x52xf32> to vector<32x52xbf16>
    %c768_201 = arith.constant 768 : index
    %c64_202 = arith.constant 64 : index
    %201 = vector.load %arg9[%c768_201, %c64_202] : memref<800x128xbf16, #tpu.memory_space<vmem>>, vector<32x52xbf16>
    tpu.vector_store %arg9[%c768_201, %c64_202], %200 {strides = array<i32>} : memref<800x128xbf16, #tpu.memory_space<vmem>>, vector<32x52xbf16>,
    %c0_203 = arith.constant 0 : index
    %c0_204 = arith.constant 0 : index
    %c0_205 = arith.constant 0 : index
    %202 = vector.load %arg1[%c0_203, %c0_204, %c0_205] : memref<2x32x64xf32, #tpu.memory_space<vmem>>, vector<1x32x64xf32>
    %203 = vector.shape_cast %202 : vector<1x32x64xf32> to vector<32x64xf32>
    %c0_206 = arith.constant 0 : index
    %c0_207 = arith.constant 0 : index
    %204 = vector.load %arg10[%c0_206, %c0_207] : memref<32x128xf32, #tpu.memory_space<vmem>>, vector<32x64xf32>
    tpu.vector_store %arg10[%c0_206, %c0_207], %203 {strides = array<i32>} : memref<32x128xf32, #tpu.memory_space<vmem>>, vector<32x64xf32>,
    %c1_208 = arith.constant 1 : index
    %c0_209 = arith.constant 0 : index
    %c0_210 = arith.constant 0 : index
    %205 = vector.load %arg1[%c1_208, %c0_209, %c0_210] : memref<2x32x64xf32, #tpu.memory_space<vmem>>, vector<1x32x64xf32>
    %206 = vector.shape_cast %205 : vector<1x32x64xf32> to vector<32x64xf32>
    %c0_211 = arith.constant 0 : index
    %c64_212 = arith.constant 64 : index
    %207 = vector.load %arg10[%c0_211, %c64_212] : memref<32x128xf32, #tpu.memory_space<vmem>>, vector<32x64xf32>
    tpu.vector_store %arg10[%c0_211, %c64_212], %206 {strides = array<i32>} : memref<32x128xf32, #tpu.memory_space<vmem>>, vector<32x64xf32>,
    %c0_213 = arith.constant 0 : index
    %c0_214 = arith.constant 0 : index
    %208 = vector.load %arg10[%c0_213, %c0_214] : memref<32x128xf32, #tpu.memory_space<vmem>>, vector<32x128xf32>
    %c0_215 = arith.constant 0 : index
    %c0_216 = arith.constant 0 : index
    %209 = vector.load %arg2[%c0_215, %c0_216] : memref<32x800xbf16, #tpu.memory_space<vmem>>, vector<32x800xbf16>
    %c0_217 = arith.constant 0 : index
    %c0_218 = arith.constant 0 : index
    %210 = vector.load %arg9[%c0_217, %c0_218] : memref<800x128xbf16, #tpu.memory_space<vmem>>, vector<800x128xbf16>
    %cst_219 = arith.constant dense<0.000000e+00> : vector<32x128xf32>
    %211 = tpu.matmul %209, %210, %cst_219 {dimension_numbers = #tpu.dot_dimension_numbers<[1], [0], [0], [1], [0, 0, 1, 1], [], []>} : vector<32x800xbf16>, vector<800x128xbf16>, vector<32x128xf32> -> vector<32x128xf32>
    %c0_220 = arith.constant 0 : index
    %c0_221 = arith.constant 0 : index
    %212 = vector.load %arg3[%c0_220, %c0_221] : memref<32x1xf32, #tpu.memory_space<vmem>>, vector<32x1xf32>
    %213 = vector.broadcast %212 : vector<32x1xf32> to vector<32x128xf32>
    %214 = arith.addf %211, %213 : vector<32x128xf32>
    %cst_222 = arith.constant 5.000000e-01 : f32
    %215 = vector.broadcast %cst_222 : f32 to vector<32x128xf32>
    %216 = arith.mulf %215, %214 : vector<32x128xf32>
    %cst_223 = arith.constant 2.000000e+00 : f32
    %217 = math.sqrt %cst_223 : f32
    %218 = vector.broadcast %217 : f32 to vector<32x128xf32>
    %219 = arith.divf %214, %218 : vector<32x128xf32>
    %220 = math.erf %219 : vector<32x128xf32>
    %cst_224 = arith.constant 1.000000e+00 : f32
    %221 = vector.broadcast %cst_224 : f32 to vector<32x128xf32>
    %222 = arith.addf %221, %220 : vector<32x128xf32>
    %223 = arith.mulf %216, %222 : vector<32x128xf32>
    %224 = arith.addf %208, %223 : vector<32x128xf32>
    %cst_225 = arith.constant dense<0.000000e+00> : vector<128xf32>
    %225 = vector.multi_reduction <add>, %224, %cst_225 [0] : vector<32x128xf32> to vector<128xf32>
    %226 = vector.shape_cast %225 : vector<128xf32> to vector<1x128xf32>
    %cst_226 = arith.constant 3.200000e+01 : f32
    %227 = vector.broadcast %cst_226 : f32 to vector<1x128xf32>
    %228 = arith.divf %226, %227 : vector<1x128xf32>
    %229 = vector.broadcast %228 : vector<1x128xf32> to vector<32x128xf32>
    %230 = arith.subf %224, %229 : vector<32x128xf32>
    %231 = vector.broadcast %228 : vector<1x128xf32> to vector<32x128xf32>
    %232 = arith.subf %224, %231 : vector<32x128xf32>
    %233 = arith.mulf %230, %232 : vector<32x128xf32>
    %cst_227 = arith.constant dense<0.000000e+00> : vector<128xf32>
    %234 = vector.multi_reduction <add>, %233, %cst_227 [0] : vector<32x128xf32> to vector<128xf32>
    %235 = vector.shape_cast %234 : vector<128xf32> to vector<1x128xf32>
    %cst_228 = arith.constant 3.200000e+01 : f32
    %236 = vector.broadcast %cst_228 : f32 to vector<1x128xf32>
    %237 = arith.divf %235, %236 : vector<1x128xf32>
    %238 = vector.broadcast %228 : vector<1x128xf32> to vector<32x128xf32>
    %239 = arith.subf %224, %238 : vector<32x128xf32>
    %cst_229 = arith.constant 9.99999974E-6 : f32
    %240 = vector.broadcast %cst_229 : f32 to vector<1x128xf32>
    %241 = arith.addf %237, %240 : vector<1x128xf32>
    %242 = math.rsqrt %241 : vector<1x128xf32>
    %243 = vector.broadcast %242 : vector<1x128xf32> to vector<32x128xf32>
    %244 = arith.mulf %239, %243 : vector<32x128xf32>
    %c0_230 = arith.constant 0 : index
    %c0_231 = arith.constant 0 : index
    %245 = vector.load %arg4[%c0_230, %c0_231] : memref<32x1xf32, #tpu.memory_space<vmem>>, vector<32x1xf32>
    %246 = vector.broadcast %245 : vector<32x1xf32> to vector<32x128xf32>
    %247 = arith.mulf %244, %246 : vector<32x128xf32>
    %c0_232 = arith.constant 0 : index
    %c0_233 = arith.constant 0 : index
    %248 = vector.load %arg5[%c0_232, %c0_233] : memref<32x1xf32, #tpu.memory_space<vmem>>, vector<32x1xf32>
    %249 = vector.broadcast %248 : vector<32x1xf32> to vector<32x128xf32>
    %250 = arith.addf %247, %249 : vector<32x128xf32>
    %c0_234 = arith.constant 0 : index
    %c0_235 = arith.constant 0 : index
    %251 = vector.load %arg6[%c0_234, %c0_235] : memref<96x32xbf16, #tpu.memory_space<vmem>>, vector<96x32xbf16>
    %252 = arith.truncf %250 : vector<32x128xf32> to vector<32x128xbf16>
    %cst_236 = arith.constant dense<0.000000e+00> : vector<96x128xf32>
    %253 = tpu.matmul %251, %252, %cst_236 {dimension_numbers = #tpu.dot_dimension_numbers<[1], [0], [0], [1], [0, 0, 1, 1], [], []>} : vector<96x32xbf16>, vector<32x128xbf16>, vector<96x128xf32> -> vector<96x128xf32>
    %c0_237 = arith.constant 0 : index
    %c0_238 = arith.constant 0 : index
    %254 = vector.load %arg7[%c0_237, %c0_238] : memref<96x1xf32, #tpu.memory_space<vmem>>, vector<96x1xf32>
    %255 = vector.broadcast %254 : vector<96x1xf32> to vector<96x128xf32>
    %256 = arith.addf %253, %255 : vector<96x128xf32>
    %c0_239 = arith.constant 0 : index
    %c0_240 = arith.constant 0 : index
    %c0_241 = arith.constant 0 : index
    %257 = vector.load %arg8[%c0_239, %c0_240, %c0_241] : memref<1x96x128xf32, #tpu.memory_space<vmem>>, vector<1x96x128xf32>
    %258 = vector.shape_cast %257 : vector<1x96x128xf32> to vector<96x128xf32>
    %259 = vector.shape_cast %256 : vector<96x128xf32> to vector<1x96x128xf32>
    tpu.vector_store %arg8[%c0_239, %c0_240, %c0_241], %259 {strides = array<i32>} : memref<1x96x128xf32, #tpu.memory_space<vmem>>, vector<1x96x128xf32>,
    return
  }
  func.func @transform_0(%arg0: i32) -> (i32, i32, i32) {
    %c0_i32 = arith.constant 0 : i32
    %c0_i32_0 = arith.constant 0 : i32
    %c0_i32_1 = arith.constant 0 : i32
    return %arg0, %c0_i32, %c0_i32_0 : i32, i32, i32
  }
  func.func @transform_1(%arg0: i32) -> (i32, i32) {
    %c0_i32 = arith.constant 0 : i32
    %c0_i32_0 = arith.constant 0 : i32
    %c0_i32_1 = arith.constant 0 : i32
    return %c0_i32, %c0_i32_0 : i32, i32
  }
  func.func @transform_2(%arg0: i32) -> (i32, i32) {
    %c0_i32 = arith.constant 0 : i32
    %c0_i32_0 = arith.constant 0 : i32
    %c0_i32_1 = arith.constant 0 : i32
    return %c0_i32, %c0_i32_0 : i32, i32
  }
  func.func @transform_3(%arg0: i32) -> (i32, i32) {
    %c0_i32 = arith.constant 0 : i32
    %c0_i32_0 = arith.constant 0 : i32
    %c0_i32_1 = arith.constant 0 : i32
    return %c0_i32, %c0_i32_0 : i32, i32
  }
  func.func @transform_4(%arg0: i32) -> (i32, i32) {
    %c0_i32 = arith.constant 0 : i32
    %c0_i32_0 = arith.constant 0 : i32
    %c0_i32_1 = arith.constant 0 : i32
    return %c0_i32, %c0_i32_0 : i32, i32
  }
  func.func @transform_5(%arg0: i32) -> (i32, i32) {
    %c0_i32 = arith.constant 0 : i32
    %c0_i32_0 = arith.constant 0 : i32
    %c0_i32_1 = arith.constant 0 : i32
    return %c0_i32, %c0_i32_0 : i32, i32
  }
  func.func @transform_6(%arg0: i32) -> (i32, i32) {
    %c0_i32 = arith.constant 0 : i32
    %c0_i32_0 = arith.constant 0 : i32
    %c0_i32_1 = arith.constant 0 : i32
    return %c0_i32, %c0_i32_0 : i32, i32
  }
  func.func @transform_7(%arg0: i32) -> (i32, i32, i32) {
    %c0_i32 = arith.constant 0 : i32
    %c0_i32_0 = arith.constant 0 : i32
    %c0_i32_1 = arith.constant 0 : i32
    return %arg0, %c0_i32, %c0_i32_0 : i32, i32, i32
  }
}

</mosaic_0001>

<bundles_post_ra>
// kernel: encoding_augment_forward.1
= control target key start
LH: loop header
LB: loop body
LE: loop exit
PB: predicated region body
PF: predicated region fallthrough
CT: control target
= control target key end

     0   :  { %v2005_v3 = vmov 0   ;;  %s2006_s9 = smov 8   ;;  %s2007_s10 = smov 72   ;;  %vm492_vm0 = vcmask 523264   ;;  %vm228_vm1 = vcmask 523328   ;;  %vm245_vm2 = vcmask 1048128   ;;  %s2586_s0 = inlined_call_operand.vmem [shape: f32[2,32,64], index: 0, kind: input, shape index: {}]   ;;  %s2587_s1 = inlined_call_operand.vmem [shape: bf16[32,800], index: 1, kind: input, shape index: {}]   ;;  %s2588_s2 = inlined_call_operand.vmem [shape: f32[32,1], index: 2, kind: input, shape index: {}]   ;;  %s2589_s3 = inlined_call_operand.vmem [shape: f32[32,1], index: 3, kind: input, shape index: {}]   ;;  %s2590_s4 = inlined_call_operand.vmem [shape: f32[32,1], index: 4, kind: input, shape index: {}]   ;;  %s2591_s6 = inlined_call_operand.vmem [shape: f32[96,1], index: 6, kind: input, shape index: {}]   ;;  %s2592_s5 = inlined_call_operand.vmem [shape: bf16[96,32], index: 5, kind: input, shape index: {}]   ;;  %s2593_s7 = inlined_call_operand.vmem [shape: f32[1,96,128], index: 7, kind: output, shape index: {}]  }
   0x1   :  { %v214_v0 = vld [vmem:[%s2586_s0] sm:$0xff]  ;;  %v215_v1 = vld [vmem:[%s2586_s0 + $0x8] sm:$0xff]  ;;  %35 = vst [vmem:[#allocation2 + $0x40] sm:$0xff] %v2005_v3  ;;  %27 = vst [vmem:[#allocation2] sm:$0xff] %v2005_v3  ;;  %1969 = vset.pattern.permute.xlu1 %v2005_v3  ;;  %1968 = vset.pattern.permute.xlu0 %v2005_v3  ;;  %s2008_s15 = smov 12   ;;  %s2009_s16 = smov 76  }
   0x2   :  { %v1682_v2 = vld [vmem:[%s2586_s0 + $0x20] sm:$0xff]  ;;  %28 = vst [vmem:[#allocation2 + $0x8] sm:$0xff] %v2005_v3  ;;  %29 = vst [vmem:[#allocation2 + $0x10] sm:$0xff] %v2005_v3  ;;  %v2104_v4 = vpack.c.bf16 %v215_v1, %v214_v0  ;;  %v1683_v5 = vld [vmem:[%s2586_s0 + $0x28] sm:$0xff]  ;;  %s2010_s21 = smov 7   ;;  %s2011_s22 = smov 11  }
   0x3   :  { %30 = vst [vmem:[#allocation2 + $0x18] sm:$0xff] %v2005_v3  ;;  %31 = vst [vmem:[#allocation2 + $0x20] sm:$0xff] %v2005_v3  ;;  %v2109_v6 = vpack.c.bf16 %v1683_v5, %v1682_v2  ;;  %v216_v7 = vld [vmem:[%s2586_s0 + $0x10] sm:$0xff]  ;;  %v217_v8 = vld [vmem:[%s2586_s0 + $0x18] sm:$0xff]  ;;  %s2012_s23 = smov 71   ;;  %s2013_s24 = smov 75  }
   0x4   :  { %32 = vst [vmem:[#allocation2 + $0x28] sm:$0xff] %v2005_v3  ;;  %33 = vst [vmem:[#allocation2 + $0x30] sm:$0xff] %v2005_v3  ;;  %222 = vrot.lane.b32.xlu0 %v2104_v4, %s2006_s9  ;;  %v2120_v9 = vpack.c.bf16 %v217_v8, %v216_v7  ;;  %v1684_v10 = vld [vmem:[%s2586_s0 + $0x30] sm:$0xff]  ;;  %v1685_v11 = vld [vmem:[%s2586_s0 + $0x38] sm:$0xff]  ;;  %s2014_s25 = smov 6   ;;  %s2015_s26 = smov 10  }
   0x5   :  { %34 = vst [vmem:[#allocation2 + $0x38] sm:$0xff] %v2005_v3  ;;  %36 = vst [vmem:[#allocation2 + $0x48] sm:$0xff] %v2005_v3  ;;  %239 = vrot.lane.b32.xlu1 %v2109_v6, %s2007_s10  ;;  %v2130_v12 = vpack.c.bf16 %v1685_v11, %v1684_v10  ;;  %s2016_s27 = smov 70   ;;  %s2017_s28 = smov 74   ;;  %v486_v13 = vld [vmem:[%s2586_s0] sm:$0xff]  ;;  %v487_v14 = vld [vmem:[%s2586_s0 + $0x8] sm:$0xff] }
   0x6   :  { %37 = vst [vmem:[#allocation2 + $0x50] sm:$0xff] %v2005_v3  ;;  %38 = vst [vmem:[#allocation2 + $0x58] sm:$0xff] %v2005_v3  ;;  %v2154_v15 = vpack.c.bf16 %v487_v14, %v486_v13  ;;  %s2019_s11 = smov 9   ;;  %v854_v16 = vld [vmem:[%s2586_s0 + $0x10] sm:$0xff]  ;;  %v855_v17 = vld [vmem:[%s2586_s0 + $0x18] sm:$0xff]  ;;  %s2021_s17 = smov 4  }
   0x7   :  { %39 = vst [vmem:[#allocation2 + $0x60] sm:$0xff] %v2005_v3  ;;  %40 = vst [vmem:[#allocation2 + $0x68] sm:$0xff] %v2005_v3  ;;  %v2171_v18 = vpack.c.bf16 %v855_v17, %v854_v16  ;;  %s2022_s18 = smov 64   ;;  %s2023_s19 = smov 73   ;;  %v1972_v19 = vld [vmem:[%s2587_s1 + $0x4] ss:$28 sps:$4 sm:$0xff]  }
   0x8   :  { %41 = vst [vmem:[#allocation2 + $0x70] sm:$0xff] %v2005_v3  ;;  %42 = vst [vmem:[#allocation2 + $0x78] sm:$0xff] %v2005_v3  ;;  %85 = vrot.lane.b32.xlu0 %v2104_v4, %s2008_s15  ;;  %s2024_s20 = smov 68   ;;  %1155 = vmatprep.mubr.bf16.mxu0 %v1972_v19  ;;  %s2031_s29 = smov 67   ;;  %vm91_vm3 = vcmask 523360   ;;  %vm109_vm4 = vcmask 1048160  }
   0x9   :  { %43 = vst [vmem:[#allocation2 + $0x80] sm:$0xff] %v2005_v3  ;;  %44 = vst [vmem:[#allocation2 + $0x88] sm:$0xff] %v2005_v3  ;;  %103 = vrot.lane.b32.xlu1 %v2109_v6, %s2009_s16  ;;  %s2032_s30 = smov 60   ;;  %s2033_s8 = smov 126   ;;  %vm262_vm5 = vcmask 523320   ;;  %vm126_vm6 = vcmask 523352  }
   0xa   :  { %45 = vst [vmem:[#allocation2 + $0x90] sm:$0xff] %v2005_v3  ;;  %46 = vst [vmem:[#allocation2 + $0x98] sm:$0xff] %v2005_v3  ;;  %s2037_s12 = smov 123   ;;  %s2038_s13 = smov 55   ;;  %vm279_vm7 = vcmask 1048120   ;;  %vm143_vm8 = vcmask 1048152  }
   0xb   :  { %47 = vst [vmem:[#allocation2 + $0xa0] sm:$0xff] %v2005_v3  ;;  %48 = vst [vmem:[#allocation2 + $0xa8] sm:$0xff] %v2005_v3  ;;  %s2039_s14 = smov 66   ;;  %vm296_vm9 = vcmask 523312   ;;  %vm160_vm10 = vcmask 523344   ;;  %vm313_vm11 = vcmask 1048112  }
   0xc   :  { %49 = vst [vmem:[#allocation2 + $0xb0] sm:$0xff] %v2005_v3  ;;  %50 = vst [vmem:[#allocation2 + $0xb8] sm:$0xff] %v2005_v3  ;;  %224 = vrot.lane.b32.xlu0 %v2120_v9, %s2006_s9  ;;  %s2034_s9 = smov 119   ;;  %vm177_vm12 = vcmask 1048144   ;;  %vm330_vm13 = vcmask 523304   ;;  %vm194_vm14 = vcmask 523336  }
   0xd   :  { %51 = vst [vmem:[#allocation2 + $0xc0] sm:$0xff] %v2005_v3  ;;  %52 = vst [vmem:[#allocation2 + $0xc8] sm:$0xff] %v2005_v3  ;;  %87 = vrot.lane.b32.xlu1 %v2120_v9, %s2008_s15  ;;  %s2040_s15 = smov 59   ;;  %v1975_v56 = vld [vmem:[%s2587_s1 + $0xc] ss:$28 sps:$4 sm:$0xff]   ;;  %vm347_vm15 = vcmask 1048104  }
   0xe   :  { %53 = vst [vmem:[#allocation2 + $0xd0] sm:$0xff] %v2005_v3  ;;  %54 = vst [vmem:[#allocation2 + $0xd8] sm:$0xff] %v2005_v3  ;;  %1204 = vmatprep.mubr.bf16.mxu1 %v1975_v56  ;;  %v2308_v61 = vld [vmem:[%s2586_s0 + $0x20] sm:$0xff]  ;;  %v2313_v62 = vld [vmem:[%s2586_s0 + $0x28] sm:$0xff] }
   0xf   :  { %55 = vst [vmem:[#allocation2 + $0xe0] sm:$0xff] %v2005_v3  ;;  %56 = vst [vmem:[#allocation2 + $0xe8] sm:$0xff] %v2005_v3  ;;  %v873_v1 = vpack.c.bf16 %v2313_v62, %v2308_v61  ;;  %v2326_v5 = vld [vmem:[%s2586_s0 + $0x30] sm:$0xff] }
  0x10   :  { %57 = vst [vmem:[#allocation2 + $0xf0] sm:$0xff] %v2005_v3  ;;  %58 = vst [vmem:[#allocation2 + $0xf8] sm:$0xff] %v2005_v3  ;;  %241 = vrot.lane.b32.xlu0 %v2130_v12, %s2007_s10  ;;  %s2018_s10 = smov 5  }
  0x11   :  { %59 = vst [vmem:[#allocation2 + $0x100] sm:$0xff] %v2005_v3  ;;  %60 = vst [vmem:[#allocation2 + $0x108] sm:$0xff] %v2005_v3  ;;  %105 = vrot.lane.b32.xlu1 %v2130_v12, %s2009_s16  ;;  %s2020_s16 = smov 69  }
  0x12   :  { %61 = vst [vmem:[#allocation2 + $0x110] sm:$0xff] %v2005_v3  ;;  %62 = vst [vmem:[#allocation2 + $0x118] sm:$0xff] %v2005_v3 }
  0x13   :  { %63 = vst [vmem:[#allocation2 + $0x120] sm:$0xff] %v2005_v3  ;;  %64 = vst [vmem:[#allocation2 + $0x128] sm:$0xff] %v2005_v3 }
  0x14   :  { %65 = vst [vmem:[#allocation2 + $0x130] sm:$0xff] %v2005_v3  ;;  %66 = vst [vmem:[#allocation2 + $0x138] sm:$0xff] %v2005_v3  ;;  %256 = vrot.lane.b32.xlu0 %v2104_v4, %s2010_s21 }
  0x15   :  { %67 = vst [vmem:[#allocation2 + $0x140] sm:$0xff] %v2005_v3  ;;  %68 = vst [vmem:[#allocation2 + $0x148] sm:$0xff] %v2005_v3  ;;  %120 = vrot.lane.b32.xlu1 %v2104_v4, %s2011_s22 }
  0x16   :  { %69 = vst [vmem:[#allocation2 + $0x150] sm:$0xff] %v2005_v3  ;;  %70 = vst [vmem:[#allocation2 + $0x158] sm:$0xff] %v2005_v3 }
  0x17   :  { %71 = vst [vmem:[#allocation2 + $0x160] sm:$0xff] %v2005_v3  ;;  %72 = vst [vmem:[#allocation2 + $0x168] sm:$0xff] %v2005_v3 }
  0x18   :  { %73 = vst [vmem:[#allocation2 + $0x170] sm:$0xff] %v2005_v3  ;;  %74 = vst [vmem:[#allocation2 + $0x178] sm:$0xff] %v2005_v3  ;;  %273 = vrot.lane.b32.xlu0 %v2109_v6, %s2012_s23 }
  0x19   :  { %75 = vst [vmem:[#allocation2 + $0x180] sm:$0xff] %v2005_v3  ;;  %76 = vst [vmem:[#allocation2 + $0x188] sm:$0xff] %v2005_v3  ;;  %137 = vrot.lane.b32.xlu1 %v2109_v6, %s2013_s24 }
  0x1a   :  { %493 = vst.msk [vmem:[#allocation2 + $0xc0] sm:$0xff] %vm492_vm0, %v2154_v15  ;;  %924 = vst.msk [vmem:[#allocation3] sm:$0xff] %vm492_vm0, %v486_v13 }
  0x1b   :  { %925 = vst.msk [vmem:[#allocation3 + $0x8] sm:$0xff] %vm492_vm0, %v487_v14  ;;  %926 = vst.msk [vmem:[#allocation3 + $0x10] sm:$0xff] %vm492_vm0, %v854_v16 }
  0x1c   :  { %258 = vrot.lane.b32.xlu0 %v2120_v9, %s2010_s21  ;;  %927 = vst.msk [vmem:[#allocation3 + $0x18] sm:$0xff] %vm492_vm0, %v855_v17  ;;  %494 = vst.msk [vmem:[#allocation2 + $0xc8] sm:$0xff] %vm492_vm0, %v2171_v18  ;;  %s2025_s21 = smov 127   ;;  %vm364_vm0 = vcmask 523296  }
  0x1d   :  { %122 = vrot.lane.b32.xlu1 %v2120_v9, %s2011_s22  ;;  %s2026_s22 = smov 120  }
  0x20   :  { %275 = vrot.lane.b32.xlu0 %v2130_v12, %s2012_s23  ;;  %s2027_s23 = smov 3  }
  0x21   :  { %139 = vrot.lane.b32.xlu1 %v2130_v12, %s2013_s24  ;;  %s2028_s24 = smov 63  }
  0x24   :  { %290 = vrot.lane.b32.xlu0 %v2104_v4, %s2014_s25 }
  0x25   :  { %154 = vrot.lane.b32.xlu1 %v2104_v4, %s2015_s26 }
  0x28   :  { %307 = vrot.lane.b32.xlu0 %v2109_v6, %s2016_s27 }
  0x29   :  { %171 = vrot.lane.b32.xlu1 %v2109_v6, %s2017_s28 }
  0x2c   :  { %292 = vrot.lane.b32.xlu0 %v2120_v9, %s2014_s25 }
  0x2d   :  { %156 = vrot.lane.b32.xlu1 %v2120_v9, %s2015_s26 }
  0x30   :  { %309 = vrot.lane.b32.xlu0 %v2130_v12, %s2016_s27  ;;  %s2029_s27 = smov 124  }
  0x31   :  { %173 = vrot.lane.b32.xlu1 %v2130_v12, %s2017_s28  ;;  %s2030_s28 = smov 56  }
  0x34   :  { %324 = vrot.lane.b32.xlu0 %v2104_v4, %s2018_s10 }
  0x35   :  { %188 = vrot.lane.b32.xlu1 %v2104_v4, %s2019_s11 }
  0x38   :  { %341 = vrot.lane.b32.xlu0 %v2109_v6, %s2020_s16 }
  0x39   :  { %358 = vrot.lane.b32.xlu1 %v2104_v4, %s2021_s17 }
  0x3c   :  { %503 = vrot.lane.b32.xlu0 %v2109_v6, %s2022_s18 }
  0x3d   :  { %205 = vrot.lane.b32.xlu1 %v2109_v6, %s2023_s19 }
  0x40   :  { %375 = vrot.lane.b32.xlu0 %v2109_v6, %s2024_s20 }
  0x41   :  { %326 = vrot.lane.b32.xlu1 %v2120_v9, %s2018_s10  ;;  %s2035_s10 = smov 2  }
  0x44   :  { %190 = vrot.lane.b32.xlu0 %v2120_v9, %s2019_s11  ;;  %s2036_s11 = smov 62  }
  0x45   :  { %343 = vrot.lane.b32.xlu1 %v2130_v12, %s2020_s16  ;;  %s2041_s16 = smov 125  }
  0x48   :  { %360 = vrot.lane.b32.xlu0 %v2120_v9, %s2021_s17  ;;  %s2042_s17 = smov 118  }
  0x49   :  { %505 = vrot.lane.b32.xlu1 %v2130_v12, %s2022_s18 }
  0x4c   :  { %207 = vrot.lane.b32.xlu0 %v2130_v12, %s2023_s19  ;;  %s2043_s19 = smov 1  }
  0x4d   :  { %377 = vrot.lane.b32.xlu1 %v2130_v12, %s2024_s20  ;;  %s2044_s20 = smov 61  }
  0x50   :  { %520 = vrot.lane.b32.xlu0 %v2104_v4, %s2025_s21 }
  0x51   :  { %758 = vrot.lane.b32.xlu1 %v2104_v4, %s2026_s22 }
  0x54   :  { %392 = vrot.lane.b32.xlu0 %v2104_v4, %s2027_s23 }
  0x55   :  { %537 = vrot.lane.b32.xlu1 %v2109_v6, %s2028_s24 }
  0x58   :  { %622 = vrot.lane.b32.xlu0 %v2104_v4, %s2029_s27 }
  0x59   :  { %775 = vrot.lane.b32.xlu1 %v2109_v6, %s2030_s28 }
  0x5c   :  { %409 = vrot.lane.b32.xlu0 %v2109_v6, %s2031_s29 }
  0x5d   :  { %639 = vrot.lane.b32.xlu1 %v2109_v6, %s2032_s30 }
  0x60   :  { %522 = vrot.lane.b32.xlu0 %v2120_v9, %s2025_s21  ;;  %s2045_s21 = smov 122  }
  0x61   :  { %760 = vrot.lane.b32.xlu1 %v2120_v9, %s2026_s22  ;;  %s2046_s22 = smov 54  }
  0x64   :  { %394 = vrot.lane.b32.xlu0 %v2120_v9, %s2027_s23  ;;  %s2047_s23 = smov 65  }
  0x65   :  { %539 = vrot.lane.b32.xlu1 %v2130_v12, %s2028_s24  ;;  %s2048_s24 = smov 58  }
  0x68   :  { %624 = vrot.lane.b32.xlu0 %v2120_v9, %s2029_s27 }
  0x69   :  { %777 = vrot.lane.b32.xlu1 %v2130_v12, %s2030_s28 }
  0x6c   :  { %411 = vrot.lane.b32.xlu0 %v2130_v12, %s2031_s29 }
  0x6d   :  { %641 = vrot.lane.b32.xlu1 %v2130_v12, %s2032_s30 }
  0x70   :  { %554 = vrot.lane.b32.xlu0 %v2104_v4, %s2033_s8 }
  0x71   :  { %792 = vrot.lane.b32.xlu1 %v2104_v4, %s2034_s9 }
  0x74   :  { %426 = vrot.lane.b32.xlu0 %v2104_v4, %s2035_s10 }
  0x75   :  { %571 = vrot.lane.b32.xlu1 %v2109_v6, %s2036_s11 }
  0x76   :  { %v223_v20 = vpop.permute.xlu0 %222 }
  0x77   :  { %229 = vst.msk [vmem:[#allocation2 + $0x40] sm:$0xff] %vm228_vm1, %v223_v20  ;;  %v240_v21 = vpop.permute.xlu1 %239 }
  0x78   :  { %246 = vst.msk [vmem:[#allocation2 + $0x40] sm:$0xff] %vm245_vm2, %v240_v21  ;;  %656 = vrot.lane.b32.xlu0 %v2104_v4, %s2037_s12 }
  0x79   :  { %809 = vrot.lane.b32.xlu1 %v2109_v6, %s2038_s13 }
  0x7a   :  { %v86_v22 = vpop.permute.xlu0 %85 }
  0x7b   :  { %92 = vst.msk [vmem:[#allocation2] sm:$0xff] %vm91_vm3, %v86_v22  ;;  %v104_v23 = vpop.permute.xlu1 %103 }
  0x7c   :  { %110 = vst.msk [vmem:[#allocation2] sm:$0xff] %vm109_vm4, %v104_v23  ;;  %443 = vrot.lane.b32.xlu0 %v2109_v6, %s2039_s14 }
  0x7d   :  { %673 = vrot.lane.b32.xlu1 %v2109_v6, %s2040_s15 }
  0x7e   :  { %v225_v24 = vpop.permute.xlu0 %224 }
  0x7f   :  { %230 = vst.msk [vmem:[#allocation2 + $0x48] sm:$0xff] %vm228_vm1, %v225_v24  ;;  %v88_v25 = vpop.permute.xlu1 %87  ;;  %v980_v26 = vld [vmem:[#allocation2 + $0x40] sm:$0xff]  ;;  %vm509_vm1 = vcmask 1048064  }
  0x80   :  { %93 = vst.msk [vmem:[#allocation2 + $0x8] sm:$0xff] %vm91_vm3, %v88_v25  ;;  %1798 = vmatprep.subr.bf16.mxu0 %v980_v26  ;;  %556 = vrot.lane.b32.xlu0 %v2120_v9, %s2033_s8  ;;  %s2049_s8 = smov 117   ;;  %vm381_vm3 = vcmask 1048096   ;;  %v1970_v25 = vld [vmem:[%s2587_s1] ss:$28 sps:$4 sm:$0xff]   ;;  %v1023_v26 = vld [vmem:[%s2588_s2 + $0x8] sm:$0xff] }
  0x81   :  { %794 = vrot.lane.b32.xlu1 %v2120_v9, %s2034_s9  ;;  %s2050_s9 = smov 121  }
  0x82   :  { %v242_v27 = vpop.permute.xlu0 %241 }
  0x83   :  { %247 = vst.msk [vmem:[#allocation2 + $0x48] sm:$0xff] %vm245_vm2, %v242_v27  ;;  %v106_v28 = vpop.permute.xlu1 %105  ;;  %v972_v29 = vld [vmem:[#allocation2] sm:$0xff]  ;;  %vm211_vm2 = vcmask 1048136  }
  0x84   :  { %111 = vst.msk [vmem:[#allocation2 + $0x8] sm:$0xff] %vm109_vm4, %v106_v28  ;;  %428 = vrot.lane.b32.xlu0 %v2120_v9, %s2035_s10  ;;  %1799 = vmatpush3.bf16.msra.mxu0 %v972_v29  ;;  %s2051_s10 = smov 53   ;;  %vm526_vm4 = vcmask 515072   ;;  %v1976_v28 = vld [vmem:[%s2587_s1 + $0x3c] ss:$28 sps:$4 sm:$0xff]  }
  0x85   :  { %573 = vrot.lane.b32.xlu1 %v2130_v12, %s2036_s11  ;;  %s2052_s11 = smov 57   ;;  %v1025_v29 = vld [vmem:[%s2588_s2 + $0x18] sm:$0xff] }
  0x86   :  { %v257_v30 = vpop.permute.xlu0 %256 }
  0x87   :  { %263 = vst.msk [vmem:[#allocation2 + $0x50] sm:$0xff] %vm262_vm5, %v257_v30  ;;  %v121_v31 = vpop.permute.xlu1 %120 }
  0x88   :  { %127 = vst.msk [vmem:[#allocation2 + $0x10] sm:$0xff] %vm126_vm6, %v121_v31  ;;  %658 = vrot.lane.b32.xlu0 %v2120_v9, %s2037_s12  ;;  %v1024_v31 = vld [vmem:[%s2588_s2 + $0x10] sm:$0xff] }
  0x89   :  { %811 = vrot.lane.b32.xlu1 %v2130_v12, %s2038_s13 }
  0x8a   :  { %v274_v32 = vpop.permute.xlu0 %273  ;;  %v981_v33 = vld [vmem:[#allocation2 + $0x48] sm:$0xff] }
  0x8b   :  { %280 = vst.msk [vmem:[#allocation2 + $0x50] sm:$0xff] %vm279_vm7, %v274_v32  ;;  %v138_v34 = vpop.permute.xlu1 %137  ;;  %1800 = vmatprep.subr.bf16.mxu0 %v981_v33  ;;  %v973_v35 = vld [vmem:[#allocation2 + $0x8] sm:$0xff]  ;;  %v964_v33 = vld [vmem:[%s2587_s1 + $0x38] sm:$0xff] }
  0x8c   :  { %144 = vst.msk [vmem:[#allocation2 + $0x10] sm:$0xff] %vm143_vm8, %v138_v34  ;;  %445 = vrot.lane.b32.xlu0 %v2130_v12, %s2039_s14  ;;  %1801 = vmatpush3.bf16.msra.mxu0 %v973_v35  ;;  %v968_v34 = vld [vmem:[%s2587_s1 + $0x54] sm:$0xff] }
  0x8d   :  { %675 = vrot.lane.b32.xlu1 %v2130_v12, %s2040_s15 }
  0x8e   :  { %v259_v36 = vpop.permute.xlu0 %258 }
  0x8f   :  { %264 = vst.msk [vmem:[#allocation2 + $0x58] sm:$0xff] %vm262_vm5, %v259_v36  ;;  %v123_v37 = vpop.permute.xlu1 %122  ;;  %vm764_vm5 = vcmask 457728   ;;  %v1777_v36 = vcombine.low %v964_v33, %v968_v34 }
  0x90   :  { %128 = vst.msk [vmem:[#allocation2 + $0x18] sm:$0xff] %vm126_vm6, %v123_v37  ;;  %588 = vrot.lane.b32.xlu0 %v2104_v4, %s2041_s16  ;;  %vm398_vm6 = vcmask 523288  }
  0x91   :  { %826 = vrot.lane.b32.xlu1 %v2104_v4, %s2042_s17 }
  0x92   :  { %v276_v38 = vpop.permute.xlu0 %275  ;;  %v982_v39 = vld [vmem:[#allocation2 + $0x50] sm:$0xff] }
  0x93   :  { %281 = vst.msk [vmem:[#allocation2 + $0x58] sm:$0xff] %vm279_vm7, %v276_v38  ;;  %v140_v40 = vpop.permute.xlu1 %139  ;;  %1802 = vmatprep.subr.bf16.mxu0 %v982_v39  ;;  %v974_v41 = vld [vmem:[#allocation2 + $0x10] sm:$0xff]  ;;  %vm543_vm7 = vcmask 1039872  }
  0x94   :  { %145 = vst.msk [vmem:[#allocation2 + $0x18] sm:$0xff] %vm143_vm8, %v140_v40  ;;  %460 = vrot.lane.b32.xlu0 %v2104_v4, %s2043_s19  ;;  %1803 = vmatpush3.bf16.msra.mxu0 %v974_v41  ;;  %vm628_vm8 = vcmask 490496   ;;  %v1982_v39 = vld [vmem:[%s2587_s1 + $0x14] ss:$28 sps:$4 sm:$0xff]  }
  0x95   :  { %605 = vrot.lane.b32.xlu1 %v2109_v6, %s2044_s20 }
  0x96   :  { %v291_v42 = vpop.permute.xlu0 %290 }
  0x97   :  { %297 = vst.msk [vmem:[#allocation2 + $0x60] sm:$0xff] %vm296_vm9, %v291_v42  ;;  %v155_v43 = vpop.permute.xlu1 %154 }
  0x98   :  { %161 = vst.msk [vmem:[#allocation2 + $0x20] sm:$0xff] %vm160_vm10, %v155_v43  ;;  %690 = vrot.lane.b32.xlu0 %v2104_v4, %s2045_s21  ;;  %v1380_v43 = vld [vmem:[%s2589_s3 + $0x8] sm:$0xff] }
  0x99   :  { %843 = vrot.lane.b32.xlu1 %v2109_v6, %s2046_s22 }
  0x9a   :  { %v308_v44 = vpop.permute.xlu0 %307  ;;  %v983_v45 = vld [vmem:[#allocation2 + $0x58] sm:$0xff] }
  0x9b   :  { %314 = vst.msk [vmem:[#allocation2 + $0x60] sm:$0xff] %vm313_vm11, %v308_v44  ;;  %v172_v46 = vpop.permute.xlu1 %171  ;;  %1804 = vmatprep.subr.bf16.mxu0 %v983_v45  ;;  %v975_v47 = vld [vmem:[#allocation2 + $0x18] sm:$0xff] }
  0x9c   :  { %178 = vst.msk [vmem:[#allocation2 + $0x20] sm:$0xff] %vm177_vm12, %v172_v46  ;;  %477 = vrot.lane.b32.xlu0 %v2109_v6, %s2047_s23  ;;  %1805 = vmatpush3.bf16.msra.mxu0 %v975_v47  ;;  %v1379_v46 = vld [vmem:[%s2589_s3] sm:$0xff] }
  0x9d   :  { %707 = vrot.lane.b32.xlu1 %v2109_v6, %s2048_s24  ;;  %v2331_v6 = vld [vmem:[%s2586_s0 + $0x38] sm:$0xff]  ;;  %s2053_s0 = smov 116  }
  0x9e   :  { %v293_v48 = vpop.permute.xlu0 %292  ;;  %v874_v11 = vpack.c.bf16 %v2331_v6, %v2326_v5 }
  0x9f   :  { %298 = vst.msk [vmem:[#allocation2 + $0x68] sm:$0xff] %vm296_vm9, %v293_v48  ;;  %v157_v49 = vpop.permute.xlu1 %156  ;;  %vm781_vm9 = vcmask 982528  }
  0xa0   :  { %162 = vst.msk [vmem:[#allocation2 + $0x28] sm:$0xff] %vm160_vm10, %v157_v49  ;;  %590 = vrot.lane.b32.xlu0 %v2120_v9, %s2041_s16  ;;  %s2054_s16 = smov 52   ;;  %vm415_vm10 = vcmask 1048088   ;;  %v1408_v49 = vld [vmem:[%s2590_s4 + $0x8] sm:$0xff] }
  0xa1   :  { %828 = vrot.lane.b32.xlu1 %v2120_v9, %s2042_s17 }
  0xa2   :  { %v310_v50 = vpop.permute.xlu0 %309  ;;  %v984_v51 = vld [vmem:[#allocation2 + $0x60] sm:$0xff] }
  0xa3   :  { %315 = vst.msk [vmem:[#allocation2 + $0x68] sm:$0xff] %vm313_vm11, %v310_v50  ;;  %v174_v52 = vpop.permute.xlu1 %173  ;;  %1806 = vmatprep.subr.bf16.mxu0 %v984_v51  ;;  %v976_v53 = vld [vmem:[#allocation2 + $0x20] sm:$0xff]  ;;  %vm645_vm11 = vcmask 1015296  }
  0xa4   :  { %179 = vst.msk [vmem:[#allocation2 + $0x28] sm:$0xff] %vm177_vm12, %v174_v52  ;;  %462 = vrot.lane.b32.xlu0 %v2120_v9, %s2043_s19  ;;  %1807 = vmatpush3.bf16.msra.mxu0 %v976_v53  ;;  %v1407_v51 = vld [vmem:[%s2590_s4] sm:$0xff]  ;;  %v1382_v53 = vld [vmem:[%s2589_s3 + $0x18] sm:$0xff]  ;;  %vm560_vm12 = vcmask 506880  }
  0xa5   :  { %607 = vrot.lane.b32.xlu1 %v2130_v12, %s2044_s20 }
  0xa6   :  { %v325_v54 = vpop.permute.xlu0 %324 }
  0xa7   :  { %331 = vst.msk [vmem:[#allocation2 + $0x70] sm:$0xff] %vm330_vm13, %v325_v54  ;;  %v189_v55 = vpop.permute.xlu1 %188 }
  0xa8   :  { %195 = vst.msk [vmem:[#allocation2 + $0x30] sm:$0xff] %vm194_vm14, %v189_v55  ;;  %692 = vrot.lane.b32.xlu0 %v2120_v9, %s2045_s21  ;;  %v1381_v55 = vld [vmem:[%s2589_s3 + $0x10] sm:$0xff] }
  0xa9   :  { %845 = vrot.lane.b32.xlu1 %v2130_v12, %s2046_s22 }
  0xaa   :  { %v342_v57 = vpop.permute.xlu0 %341  ;;  %v985_v58 = vld [vmem:[#allocation2 + $0x68] sm:$0xff] }
  0xab   :  { %348 = vst.msk [vmem:[#allocation2 + $0x70] sm:$0xff] %vm347_vm15, %v342_v57  ;;  %v359_v59 = vpop.permute.xlu1 %358  ;;  %1808 = vmatprep.subr.bf16.mxu0 %v985_v58  ;;  %v977_v60 = vld [vmem:[#allocation2 + $0x28] sm:$0xff]  ;;  %v1410_v58 = vld [vmem:[%s2590_s4 + $0x18] sm:$0xff] }
  0xac   :  { %365 = vst.msk [vmem:[#allocation2 + $0x80] sm:$0xff] %vm364_vm0, %v359_v59  ;;  %479 = vrot.lane.b32.xlu0 %v2130_v12, %s2047_s23  ;;  %1809 = vmatpush3.bf16.msra.mxu0 %v977_v60  ;;  %v1409_v60 = vld [vmem:[%s2590_s4 + $0x10] sm:$0xff] }
  0xad   :  { %709 = vrot.lane.b32.xlu1 %v2130_v12, %s2048_s24 }
  0xae   :  { %v504_v63 = vpop.permute.xlu0 %503 }
  0xaf   :  { %510 = vst.msk [vmem:[#allocation2 + $0xc0] sm:$0xff] %vm509_vm1, %v504_v63  ;;  %v206_v0 = vpop.permute.xlu1 %205  ;;  %v1450_v63 = vld [vmem:[%s2591_s6 + $0x8] sm:$0xff] }
  0xb0   :  { %212 = vst.msk [vmem:[#allocation2 + $0x30] sm:$0xff] %vm211_vm2, %v206_v0  ;;  %860 = vrot.lane.b32.xlu0 %v2154_v15, %s2049_s8 }
  0xb1   :  { %724 = vrot.lane.b32.xlu1 %v2154_v15, %s2050_s9 }
  0xb2   :  { %v376_v2 = vpop.permute.xlu0 %375  ;;  %v986_v3 = vld [vmem:[#allocation2 + $0x70] sm:$0xff] }
  0xb3   :  { %382 = vst.msk [vmem:[#allocation2 + $0x80] sm:$0xff] %vm381_vm3, %v376_v2  ;;  %v327_v4 = vpop.permute.xlu1 %326  ;;  %1810 = vmatprep.subr.bf16.mxu0 %v986_v3  ;;  %v1449_v2 = vld [vmem:[%s2591_s6] sm:$0xff] }
  0xb4   :  { %332 = vst.msk [vmem:[#allocation2 + $0x78] sm:$0xff] %vm330_vm13, %v327_v4  ;;  %877 = vrot.lane.b32.xlu0 %v873_v1, %s2051_s10  ;;  %vm798_vm13 = vcmask 449536  }
  0xb5   :  { %741 = vrot.lane.b32.xlu1 %v873_v1, %s2052_s11 }
  0xb6   :  { %v191_v7 = vpop.permute.xlu0 %190  ;;  %v996_v8 = vld [vmem:[#allocation2 + $0xc0] sm:$0xff] }
  0xb7   :  { %196 = vst.msk [vmem:[#allocation2 + $0x38] sm:$0xff] %vm194_vm14, %v191_v7  ;;  %v344_v9 = vpop.permute.xlu1 %343  ;;  %1826 = vmatprep.subr.bf16.mxu1 %v996_v8  ;;  %v978_v10 = vld [vmem:[#allocation2 + $0x30] sm:$0xff]  ;;  %vm432_vm14 = vcmask 523280  }
  0xb8   :  { %349 = vst.msk [vmem:[#allocation2 + $0x78] sm:$0xff] %vm347_vm15, %v344_v9  ;;  %862 = vrot.lane.b32.xlu0 %v2171_v18, %s2049_s8  ;;  %1811 = vmatpush3.bf16.msra.mxu0 %v978_v10  ;;  %vm577_vm15 = vcmask 1031680   ;;  %v1451_v7 = vld [vmem:[%s2591_s6 + $0x10] sm:$0xff]  ;;  %v1454_v9 = vld [vmem:[%s2591_s6 + $0x28] sm:$0xff] }
  0xb9   :  { %726 = vrot.lane.b32.xlu1 %v2171_v18, %s2050_s9 }
  0xba   :  { %v361_v12 = vpop.permute.xlu0 %360  ;;  %v988_v13 = vld [vmem:[#allocation2 + $0x80] sm:$0xff] }
  0xbb   :  { %366 = vst.msk [vmem:[#allocation2 + $0x88] sm:$0xff] %vm364_vm0, %v361_v12  ;;  %v506_v14 = vpop.permute.xlu1 %505  ;;  %1827 = vmatpush3.bf16.msra.mxu1 %v988_v13  ;;  %vm662_vm0 = vcmask 482304  }
  0xbc   :  { %511 = vst.msk [vmem:[#allocation2 + $0xc8] sm:$0xff] %vm509_vm1, %v506_v14  ;;  %879 = vrot.lane.b32.xlu0 %v874_v11, %s2051_s10  ;;  %v1456_v14 = vld [vmem:[%s2591_s6 + $0x38] sm:$0xff] }
  0xbd   :  { %743 = vrot.lane.b32.xlu1 %v874_v11, %s2052_s11 }
  0xbe   :  { %v208_v16 = vpop.permute.xlu0 %207 }
  0xbf   :  { %213 = vst.msk [vmem:[#allocation2 + $0x38] sm:$0xff] %vm211_vm2, %v208_v16  ;;  %v378_v17 = vpop.permute.xlu1 %377  ;;  %v987_v19 = vld [vmem:[#allocation2 + $0x78] sm:$0xff]  ;;  %vm815_vm2 = vcmask 974336  }
  0xc0   :  { %383 = vst.msk [vmem:[#allocation2 + $0x88] sm:$0xff] %vm381_vm3, %v378_v17  ;;  %894 = vrot.lane.b32.xlu0 %v2154_v15, %s2053_s0  ;;  %1812 = vmatprep.subr.bf16.mxu0 %v987_v19  ;;  %v1022_v15 = vld [vmem:[%s2588_s2] sm:$0xff]  ;;  %vm449_vm3 = vcmask 1048080   ;;  %v1455_v17 = vld [vmem:[%s2591_s6 + $0x30] sm:$0xff] }
  0xc1   :  { %911 = vrot.lane.b32.xlu1 %v873_v1, %s2054_s16 }
  0xc2   :  { %v521_v20 = vpop.permute.xlu0 %520 }
  0xc3   :  { %527 = vst.msk [vmem:[#allocation2 + $0xd0] sm:$0xff] %vm526_vm4, %v521_v20  ;;  %v759_v21 = vpop.permute.xlu1 %758  ;;  %v997_v22 = vld [vmem:[#allocation2 + $0xc8] sm:$0xff] }
  0xc4   :  { %765 = vst.msk [vmem:[#allocation2 + $0x140] sm:$0xff] %vm764_vm5, %v759_v21  ;;  %896 = vrot.lane.b32.xlu0 %v2171_v18, %s2053_s0  ;;  %1828 = vmatprep.subr.bf16.mxu1 %v997_v22  ;;  %v1458_v21 = vld [vmem:[%s2591_s6 + $0x48] sm:$0xff] }
  0xc5   :  { %913 = vrot.lane.b32.xlu1 %v874_v11, %s2054_s16  ;;  %v1453_v11 = vld [vmem:[%s2591_s6 + $0x20] sm:$0xff] }
  0xc6   :  { %v393_v23 = vpop.permute.xlu0 %392  ;;  %v979_v24 = vld [vmem:[#allocation2 + $0x38] sm:$0xff] }
  0xc7   :  { %399 = vst.msk [vmem:[#allocation2 + $0x90] sm:$0xff] %vm398_vm6, %v393_v23  ;;  %v538_v18 = vpop.permute.xlu1 %537  ;;  %1813 = vmatpush3.bf16.msra.mxu0 %v979_v24  ;;  %v989_v27 = vld [vmem:[#allocation2 + $0x88] sm:$0xff]  ;;  %v1457_v23 = vld [vmem:[%s2591_s6 + $0x40] sm:$0xff] }
  0xc8   :  { %544 = vst.msk [vmem:[#allocation2 + $0xd0] sm:$0xff] %vm543_vm7, %v538_v18  ;;  %1829 = vmatpush3.bf16.msra.mxu1 %v989_v27  ;;  %1028 = vperm.xlu0 %1968, %v1022_v15   ;;  %v1459_v27 = vld [vmem:[%s2591_s6 + $0x50] sm:$0xff] }
  0xc9   :  { %1033 = vperm.xlu1 %1969, %v1023_v26   ;;  %v1460_v26 = vld [vmem:[%s2591_s6 + $0x58] sm:$0xff] }
  0xca   :  { %v623_v30 = vpop.permute.xlu0 %622  ;;  %1156 = vmatmul.mubr.bf16.vlgmr.msra.gmra.mrb[0].mxu0 %v1970_v25 }
  0xcb   :  { %629 = vst.msk [vmem:[#allocation2 + $0x100] sm:$0xff] %vm628_vm8, %v623_v30  ;;  %v776_v32 = vpop.permute.xlu1 %775  ;;  %1163 = vmatprep.mubr.bf16.mxu0 %v1976_v28 }
  0xcc   :  { %782 = vst.msk [vmem:[#allocation2 + $0x140] sm:$0xff] %vm781_vm9, %v776_v32  ;;  %1043 = vperm.xlu0 %1968, %v1025_v29  }
  0xcd   :  { %1038 = vperm.xlu1 %1969, %v1024_v31  }
  0xce   :  { %v410_v35 = vpop.permute.xlu0 %409 }
  0xcf   :  { %416 = vst.msk [vmem:[#allocation2 + $0x90] sm:$0xff] %vm415_vm10, %v410_v35  ;;  %v640_v37 = vpop.permute.xlu1 %639  ;;  %v998_v38 = vld [vmem:[#allocation2 + $0xd0] sm:$0xff] }
  0xd0   :  { %646 = vst.msk [vmem:[#allocation2 + $0x100] sm:$0xff] %vm645_vm11, %v640_v37  ;;  %1830 = vmatprep.subr.bf16.mxu1 %v998_v38  ;;  %938 = vrot.lane.b32.xlu0 %v2313_v62, %s2022_s18 }
  0xd1   :  { %936 = vrot.lane.b32.xlu1 %v2308_v61, %s2022_s18 }
  0xd2   :  { %v523_v40 = vpop.permute.xlu0 %522  ;;  %1164 = vmatmul.mubr.bf16.gmra.mrb[4].mxu0 %v1777_v36 }
  0xd3   :  { %528 = vst.msk [vmem:[#allocation2 + $0xd8] sm:$0xff] %vm526_vm4, %v523_v40  ;;  %v761_v41 = vpop.permute.xlu1 %760  ;;  %v1012_v42 = vld [vmem:[#allocation2 + $0x140] sm:$0xff]  ;;  %1253 = vmatprep.mubr.bf16.mxu0 %v1982_v39  ;;  %vm679_vm4 = vcmask 1007104  }
  0xd4   :  { %766 = vst.msk [vmem:[#allocation2 + $0x148] sm:$0xff] %vm764_vm5, %v761_v41  ;;  %1854 = vmatprep.subr.bf16.mxu0 %v1012_v42  ;;  %942 = vrot.lane.b32.xlu0 %v2331_v6, %s2022_s18  ;;  %vm594_vm5 = vcmask 498688  }
  0xd5   :  { %940 = vrot.lane.b32.xlu1 %v2326_v5, %s2022_s18  ;;  %v1452_v5 = vld [vmem:[%s2591_s6 + $0x18] sm:$0xff] }
  0xd6   :  { %v395_v44 = vpop.permute.xlu0 %394  ;;  %v990_v45 = vld [vmem:[#allocation2 + $0x90] sm:$0xff] }
  0xd7   :  { %400 = vst.msk [vmem:[#allocation2 + $0x98] sm:$0xff] %vm398_vm6, %v395_v44  ;;  %v540_v47 = vpop.permute.xlu1 %539  ;;  %1831 = vmatpush3.bf16.msra.mxu1 %v990_v45  ;;  %v1004_v48 = vld [vmem:[#allocation2 + $0x100] sm:$0xff]  ;;  %vm832_vm6 = vcmask 441344  }
  0xd8   :  { %545 = vst.msk [vmem:[#allocation2 + $0xd8] sm:$0xff] %vm543_vm7, %v540_v47  ;;  %1855 = vmatpush3.bf16.msra.mxu0 %v1004_v48  ;;  %1390 = vperm.xlu0 %1968, %v1380_v43   ;;  %vm466_vm7 = vcmask 523272  }
  0xd9   :  { %1385 = vperm.xlu1 %1969, %v1379_v46  }
  0xda   :  { %v625_v50 = vpop.permute.xlu0 %624 }
  0xdb   :  { %630 = vst.msk [vmem:[#allocation2 + $0x108] sm:$0xff] %vm628_vm8, %v625_v50  ;;  %v778_v52 = vpop.permute.xlu1 %777  ;;  %vm611_vm8 = vcmask 1023488  }
  0xdc   :  { %783 = vst.msk [vmem:[#allocation2 + $0x148] sm:$0xff] %vm781_vm9, %v778_v52  ;;  %1418 = vperm.xlu0 %1968, %v1408_v49   ;;  %vm696_vm9 = vcmask 474112  }
  0xdd   :  { %1413 = vperm.xlu1 %1969, %v1407_v51  }
  0xde   :  { %v412_v54 = vpop.permute.xlu0 %411 }
  0xdf   :  { %417 = vst.msk [vmem:[#allocation2 + $0x98] sm:$0xff] %vm415_vm10, %v412_v54  ;;  %v642_v56 = vpop.permute.xlu1 %641  ;;  %v999_v57 = vld [vmem:[#allocation2 + $0xd8] sm:$0xff]  ;;  %vm849_vm10 = vcmask 966144  }
  0xe0   :  { %647 = vst.msk [vmem:[#allocation2 + $0x108] sm:$0xff] %vm645_vm11, %v642_v56  ;;  %1832 = vmatprep.subr.bf16.mxu1 %v999_v57  ;;  %1400 = vperm.xlu0 %1968, %v1382_v53   ;;  %vm483_vm11 = vcmask 1048072  }
  0xe1   :  { %1395 = vperm.xlu1 %1969, %v1381_v55  }
  0xe2   :  { %v555_v59 = vpop.permute.xlu0 %554 }
  0xe3   :  { %561 = vst.msk [vmem:[#allocation2 + $0xe0] sm:$0xff] %vm560_vm12, %v555_v59  ;;  %v793_v61 = vpop.permute.xlu1 %792  ;;  %v1013_v62 = vld [vmem:[#allocation2 + $0x148] sm:$0xff] }
  0xe4   :  { %799 = vst.msk [vmem:[#allocation2 + $0x150] sm:$0xff] %vm798_vm13, %v793_v61  ;;  %1856 = vmatprep.subr.bf16.mxu0 %v1013_v62  ;;  %1428 = vperm.xlu0 %1968, %v1410_v58   ;;  %v1973_v61 = vld [vmem:[%s2587_s1 + $0x8] ss:$28 sps:$4 sm:$0xff]  }
  0xe5   :  { %1423 = vperm.xlu1 %1969, %v1409_v60  }
  0xe6   :  { %v427_v0 = vpop.permute.xlu0 %426  ;;  %v991_v1 = vld [vmem:[#allocation2 + $0x98] sm:$0xff] }
  0xe7   :  { %433 = vst.msk [vmem:[#allocation2 + $0xa0] sm:$0xff] %vm432_vm14, %v427_v0  ;;  %v572_v3 = vpop.permute.xlu1 %571  ;;  %1833 = vmatpush3.bf16.msra.mxu1 %v991_v1  ;;  %v1005_v4 = vld [vmem:[#allocation2 + $0x108] sm:$0xff]  ;;  %v1978_v0 = vld [vmem:[%s2587_s1 + $0x44] ss:$28 sps:$4 sm:$0xff]  }
  0xe8   :  { %578 = vst.msk [vmem:[#allocation2 + $0xe0] sm:$0xff] %vm577_vm15, %v572_v3  ;;  %1857 = vmatpush3.bf16.msra.mxu0 %v1005_v4  ;;  %1468 = vperm.xlu0 %1968, %v1450_v63  }
  0xe9   :  { %1463 = vperm.xlu1 %1969, %v1449_v2  }
  0xea   :  { %v657_v6 = vpop.permute.xlu0 %656 }
  0xeb   :  { %663 = vst.msk [vmem:[#allocation2 + $0x110] sm:$0xff] %vm662_vm0, %v657_v6  ;;  %v810_v8 = vpop.permute.xlu1 %809 }
  0xec   :  { %816 = vst.msk [vmem:[#allocation2 + $0x150] sm:$0xff] %vm815_vm2, %v810_v8  ;;  %1478 = vperm.xlu0 %1968, %v1452_v5   ;;  %v1983_v5 = vld [vmem:[%s2587_s1 + $0x40] ss:$28 sps:$4 sm:$0xff]   ;;  %v1987_v8 = vld [vmem:[%s2587_s1 + $0x18] ss:$28 sps:$4 sm:$0xff]  }
  0xed   :  { %1473 = vperm.xlu1 %1969, %v1451_v7  }
  0xee   :  { %v444_v10 = vpop.permute.xlu0 %443 }
  0xef   :  { %450 = vst.msk [vmem:[#allocation2 + $0xa0] sm:$0xff] %vm449_vm3, %v444_v10  ;;  %v674_v12 = vpop.permute.xlu1 %673  ;;  %v1000_v13 = vld [vmem:[#allocation2 + $0xe0] sm:$0xff] }
  0xf0   :  { %680 = vst.msk [vmem:[#allocation2 + $0x110] sm:$0xff] %vm679_vm4, %v674_v12  ;;  %1834 = vmatprep.subr.bf16.mxu1 %v1000_v13  ;;  %1488 = vperm.xlu0 %1968, %v1454_v9  }
  0xf1   :  { %1483 = vperm.xlu1 %1969, %v1453_v11  }
  0xf2   :  { %v557_v16 = vpop.permute.xlu0 %556 }
  0xf3   :  { %562 = vst.msk [vmem:[#allocation2 + $0xe8] sm:$0xff] %vm560_vm12, %v557_v16  ;;  %v795_v19 = vpop.permute.xlu1 %794  ;;  %v1014_v20 = vld [vmem:[#allocation2 + $0x150] sm:$0xff]  ;;  %vm713_vm12 = vcmask 998912  }
  0xf4   :  { %800 = vst.msk [vmem:[#allocation2 + $0x158] sm:$0xff] %vm798_vm13, %v795_v19  ;;  %1858 = vmatprep.subr.bf16.mxu0 %v1014_v20  ;;  %1498 = vperm.xlu0 %1968, %v1456_v14   ;;  %vm866_vm13 = vcmask 433152   ;;  %v1980_v16 = vld [vmem:[%s2587_s1 + $0x10] ss:$28 sps:$4 sm:$0xff]  }
  0xf5   :  { %1493 = vperm.xlu1 %1969, %v1455_v17   ;;  %v1984_v17 = vld [vmem:[%s2587_s1 + $0x4c] ss:$28 sps:$4 sm:$0xff]  }
  0xf6   :  { %v429_v22 = vpop.permute.xlu0 %428  ;;  %v992_v15 = vld [vmem:[#allocation2 + $0xa0] sm:$0xff] }
  0xf7   :  { %434 = vst.msk [vmem:[#allocation2 + $0xa8] sm:$0xff] %vm432_vm14, %v429_v22  ;;  %v574_v24 = vpop.permute.xlu1 %573  ;;  %1835 = vmatpush3.bf16.msra.mxu1 %v992_v15  ;;  %v1006_v25 = vld [vmem:[#allocation2 + $0x110] sm:$0xff]  ;;  %vm730_vm14 = vcmask 465920  }
  0xf8   :  { %579 = vst.msk [vmem:[#allocation2 + $0xe8] sm:$0xff] %vm577_vm15, %v574_v24  ;;  %1859 = vmatpush3.bf16.msra.mxu0 %v1006_v25  ;;  %1508 = vperm.xlu0 %1968, %v1458_v21   ;;  %vm883_vm15 = vcmask 957952   ;;  %v1986_v21 = vld [vmem:[%s2587_s1 + $0x48] ss:$28 sps:$4 sm:$0xff]   ;;  %v1988_v22 = vld [vmem:[%s2587_s1 + $0x50] ss:$28 sps:$4 sm:$0xff]  }
  0xf9   :  { %1503 = vperm.xlu1 %1969, %v1457_v23  }
  0xfa   :  { %v659_v18 = vpop.permute.xlu0 %658 }
  0xfb   :  { %664 = vst.msk [vmem:[#allocation2 + $0x118] sm:$0xff] %vm662_vm0, %v659_v18  ;;  %v812_v28 = vpop.permute.xlu1 %811  ;;  %vm747_vm0 = vcmask 990720  }
  0xfc   :  { %817 = vst.msk [vmem:[#allocation2 + $0x158] sm:$0xff] %vm815_vm2, %v812_v28  ;;  %1518 = vperm.xlu0 %1968, %v1460_v26   ;;  %vm900_vm2 = vcmask 424960  }
  0xfd   :  { %1513 = vperm.xlu1 %1969, %v1459_v27  }
  0xfe   :  { %v446_v29 = vpop.permute.xlu0 %445 }
  0xff   :  { %451 = vst.msk [vmem:[#allocation2 + $0xa8] sm:$0xff] %vm449_vm3, %v446_v29  ;;  %v676_v30 = vpop.permute.xlu1 %675  ;;  %v1001_v31 = vld [vmem:[#allocation2 + $0xe8] sm:$0xff]  ;;  %vm1116_vm3 = vcmask 261120  }
 0x100   :  { %681 = vst.msk [vmem:[#allocation2 + $0x118] sm:$0xff] %vm679_vm4, %v676_v30  ;;  %1836 = vmatprep.subr.bf16.mxu1 %v1001_v31  ;;  %vm917_vm4 = vcmask 949760  }
 0x102   :  { %v589_v32 = vpop.permute.xlu0 %588 }
 0x103   :  { %595 = vst.msk [vmem:[#allocation2 + $0xf0] sm:$0xff] %vm594_vm5, %v589_v32  ;;  %v827_v33 = vpop.permute.xlu1 %826  ;;  %v1015_v34 = vld [vmem:[#allocation2 + $0x158] sm:$0xff] }
 0x104   :  { %833 = vst.msk [vmem:[#allocation2 + $0x160] sm:$0xff] %vm832_vm6, %v827_v33  ;;  %1860 = vmatprep.subr.bf16.mxu0 %v1015_v34 }
 0x106   :  { %v461_v35 = vpop.permute.xlu0 %460  ;;  %v993_v36 = vld [vmem:[#allocation2 + $0xa8] sm:$0xff] }
 0x107   :  { %467 = vst.msk [vmem:[#allocation2 + $0xb0] sm:$0xff] %vm466_vm7, %v461_v35  ;;  %v606_v37 = vpop.permute.xlu1 %605  ;;  %1837 = vmatpush3.bf16.msra.mxu1 %v993_v36  ;;  %v1007_v38 = vld [vmem:[#allocation2 + $0x118] sm:$0xff] }
 0x108   :  { %612 = vst.msk [vmem:[#allocation2 + $0xf0] sm:$0xff] %vm611_vm8, %v606_v37  ;;  %1861 = vmatpush3.bf16.msra.mxu0 %v1007_v38 }
 0x10a   :  { %v691_v39 = vpop.permute.xlu0 %690 }
 0x10b   :  { %697 = vst.msk [vmem:[#allocation2 + $0x120] sm:$0xff] %vm696_vm9, %v691_v39  ;;  %v844_v40 = vpop.permute.xlu1 %843 }
 0x10c   :  { %850 = vst.msk [vmem:[#allocation2 + $0x160] sm:$0xff] %vm849_vm10, %v844_v40 }
 0x10e   :  { %v478_v41 = vpop.permute.xlu0 %477 }
 0x10f   :  { %484 = vst.msk [vmem:[#allocation2 + $0xb0] sm:$0xff] %vm483_vm11, %v478_v41  ;;  %v708_v42 = vpop.permute.xlu1 %707  ;;  %v1002_v43 = vld [vmem:[#allocation2 + $0xf0] sm:$0xff]  ;;  %v1989_v41 = vld [vmem:[%s2592_s5] sm:$0xff]  }
 0x110   :  { %714 = vst.msk [vmem:[#allocation2 + $0x120] sm:$0xff] %vm713_vm12, %v708_v42  ;;  %1838 = vmatprep.subr.bf16.mxu1 %v1002_v43 }
 0x112   :  { %v591_v44 = vpop.permute.xlu0 %590 }
 0x113   :  { %596 = vst.msk [vmem:[#allocation2 + $0xf8] sm:$0xff] %vm594_vm5, %v591_v44  ;;  %v829_v45 = vpop.permute.xlu1 %828  ;;  %v1016_v46 = vld [vmem:[#allocation2 + $0x160] sm:$0xff] }
 0x114   :  { %834 = vst.msk [vmem:[#allocation2 + $0x168] sm:$0xff] %vm832_vm6, %v829_v45  ;;  %1862 = vmatprep.subr.bf16.mxu0 %v1016_v46 }
 0x116   :  { %v463_v47 = vpop.permute.xlu0 %462  ;;  %v994_v48 = vld [vmem:[#allocation2 + $0xb0] sm:$0xff] }
 0x117   :  { %468 = vst.msk [vmem:[#allocation2 + $0xb8] sm:$0xff] %vm466_vm7, %v463_v47  ;;  %v608_v49 = vpop.permute.xlu1 %607  ;;  %1839 = vmatpush3.bf16.msra.mxu1 %v994_v48  ;;  %v1008_v50 = vld [vmem:[#allocation2 + $0x120] sm:$0xff] }
 0x118   :  { %613 = vst.msk [vmem:[#allocation2 + $0xf8] sm:$0xff] %vm611_vm8, %v608_v49  ;;  %1863 = vmatpush3.bf16.msra.mxu0 %v1008_v50 }
 0x11a   :  { %v693_v51 = vpop.permute.xlu0 %692 }
 0x11b   :  { %698 = vst.msk [vmem:[#allocation2 + $0x128] sm:$0xff] %vm696_vm9, %v693_v51  ;;  %v846_v52 = vpop.permute.xlu1 %845 }
 0x11c   :  { %851 = vst.msk [vmem:[#allocation2 + $0x168] sm:$0xff] %vm849_vm10, %v846_v52 }
 0x11e   :  { %v480_v53 = vpop.permute.xlu0 %479 }
 0x11f   :  { %485 = vst.msk [vmem:[#allocation2 + $0xb8] sm:$0xff] %vm483_vm11, %v480_v53  ;;  %v710_v54 = vpop.permute.xlu1 %709  ;;  %v1003_v55 = vld [vmem:[#allocation2 + $0xf8] sm:$0xff] }
 0x120   :  { %715 = vst.msk [vmem:[#allocation2 + $0x128] sm:$0xff] %vm713_vm12, %v710_v54  ;;  %1840 = vmatprep.subr.bf16.mxu1 %v1003_v55 }
 0x122   :  { %v861_v56 = vpop.permute.xlu0 %860 }
 0x123   :  { %867 = vst.msk [vmem:[#allocation2 + $0x170] sm:$0xff] %vm866_vm13, %v861_v56  ;;  %v725_v57 = vpop.permute.xlu1 %724  ;;  %v1017_v58 = vld [vmem:[#allocation2 + $0x168] sm:$0xff] }
 0x124   :  { %731 = vst.msk [vmem:[#allocation2 + $0x130] sm:$0xff] %vm730_vm14, %v725_v57  ;;  %1864 = vmatprep.subr.bf16.mxu0 %v1017_v58 }
 0x126   :  { %v878_v59 = vpop.permute.xlu0 %877  ;;  %v995_v60 = vld [vmem:[#allocation2 + $0xb8] sm:$0xff] }
 0x127   :  { %884 = vst.msk [vmem:[#allocation2 + $0x170] sm:$0xff] %vm883_vm15, %v878_v59  ;;  %v742_v62 = vpop.permute.xlu1 %741  ;;  %1841 = vmatpush3.bf16.msra.mxu1 %v995_v60  ;;  %v1009_v63 = vld [vmem:[#allocation2 + $0x128] sm:$0xff] }
 0x128   :  { %748 = vst.msk [vmem:[#allocation2 + $0x130] sm:$0xff] %vm747_vm0, %v742_v62  ;;  %1865 = vmatpush3.bf16.msra.mxu0 %v1009_v63 }
 0x12a   :  { %1205 = vmatmul.mubr.bf16.vlgmr.msra.gmra.mrb[0].mxu1 %v1973_v61  ;;  %v863_v1 = vpop.permute.xlu0 %862 }
 0x12b   :  { %868 = vst.msk [vmem:[#allocation2 + $0x178] sm:$0xff] %vm866_vm13, %v863_v1  ;;  %v727_v2 = vpop.permute.xlu1 %726  ;;  %1212 = vmatprep.mubr.bf16.mxu1 %v1978_v0 }
 0x12c   :  { %732 = vst.msk [vmem:[#allocation2 + $0x138] sm:$0xff] %vm730_vm14, %v727_v2 }
 0x12e   :  { %v880_v3 = vpop.permute.xlu0 %879  ;;  %v1018_v4 = vld [vmem:[#allocation2 + $0x170] sm:$0xff] }
 0x12f   :  { %885 = vst.msk [vmem:[#allocation2 + $0x178] sm:$0xff] %vm883_vm15, %v880_v3  ;;  %v744_v6 = vpop.permute.xlu1 %743  ;;  %1866 = vmatprep.subr.bf16.mxu0 %v1018_v4  ;;  %v1010_v7 = vld [vmem:[#allocation2 + $0x130] sm:$0xff] }
 0x130   :  { %749 = vst.msk [vmem:[#allocation2 + $0x138] sm:$0xff] %vm747_vm0, %v744_v6  ;;  %1867 = vmatpush3.bf16.msra.mxu0 %v1010_v7 }
 0x132   :  { %v895_v9 = vpop.permute.xlu0 %894  ;;  %1213 = vmatmul.mubr.bf16.gmra.mrb[4].mxu1 %v1983_v5 }
 0x133   :  { %901 = vst.msk [vmem:[#allocation2 + $0x180] sm:$0xff] %vm900_vm2, %v895_v9  ;;  %v912_v10 = vpop.permute.xlu1 %911  ;;  %1898 = vmatprep.mubr.msk.bf16.mxu1 %vm1116_vm3, %v1987_v8 }
 0x134   :  { %918 = vst.msk [vmem:[#allocation2 + $0x180] sm:$0xff] %vm917_vm4, %v912_v10 }
 0x136   :  { %v897_v11 = vpop.permute.xlu0 %896  ;;  %v1019_v12 = vld [vmem:[#allocation2 + $0x178] sm:$0xff] }
 0x137   :  { %902 = vst.msk [vmem:[#allocation2 + $0x188] sm:$0xff] %vm900_vm2, %v897_v11  ;;  %v914_v13 = vpop.permute.xlu1 %913  ;;  %1868 = vmatprep.subr.bf16.mxu0 %v1019_v12  ;;  %v1011_v14 = vld [vmem:[#allocation2 + $0x138] sm:$0xff] }
 0x138   :  { %919 = vst.msk [vmem:[#allocation2 + $0x188] sm:$0xff] %vm917_vm4, %v914_v13  ;;  %1869 = vmatpush3.bf16.msra.mxu0 %v1011_v14 }
 0x13b   :  { %1254 = vmatmul.mubr.bf16.vlgmr.msra.gmra.mrb[8].mxu0 %v1980_v16  ;;  %v1020_v19 = vld [vmem:[#allocation2 + $0x180] sm:$0xff] }
 0x13c   :  { %1894 = vmatprep.subr.bf16.mxu1 %v1020_v19  ;;  %1261 = vmatprep.mubr.bf16.mxu0 %v1984_v17 }
 0x13d   :  { %1895 = vmatpush3.bf16.msra.mxu1 %v1020_v19 }
 0x13f   :  { %v1021_v20 = vld [vmem:[#allocation2 + $0x188] sm:$0xff] }
 0x140   :  { %1896 = vmatprep.subr.bf16.mxu1 %v1021_v20 }
 0x141   :  { %1897 = vmatpush3.bf16.msra.mxu1 %v1021_v20 }
 0x143   :  { %1262 = vmatmul.mubr.bf16.gmra.mrb[12].mxu0 %v1986_v21 }
 0x144   :  { %1899 = vmatmul.mubr.msk.bf16.vlgmr.msra.gmra.mrb[8].mxu1 %vm1116_vm3, %v1988_v22 }
 0x145   :  { %1906 = vmatprep.mubr.msk.bf16.mxu1 %vm1116_vm3, %v1989_v41 }
 0x147   :  { %v1029_v15 = vpop.permute.xlu0 %1028 }
 0x148   :  { %v1034_v23 = vpop.permute.xlu1 %1033 }
 0x14b   :  { %v1044_v24 = vpop.permute.xlu0 %1043 }
 0x14c   :  { %v1039_v25 = vpop.permute.xlu1 %1038 }
 0x14f   :  { %v939_v26 = vpop.permute.xlu0 %938 }
 0x150   :  { %v937_v18 = vpop.permute.xlu1 %936  ;;  %949 = vst.msk [vmem:[#allocation3 + $0x8] sm:$0xff] %vm509_vm1, %v939_v26 }
 0x151   :  { %948 = vst.msk [vmem:[#allocation3] sm:$0xff] %vm509_vm1, %v937_v18 }
 0x153   :  { %v943_v27 = vpop.permute.xlu0 %942 }
 0x154   :  { %v941_v28 = vpop.permute.xlu1 %940  ;;  %951 = vst.msk [vmem:[#allocation3 + $0x18] sm:$0xff] %vm509_vm1, %v943_v27 }
 0x155   :  { %950 = vst.msk [vmem:[#allocation3 + $0x10] sm:$0xff] %vm509_vm1, %v941_v28 }
 0x19d   :  { %v1814_v29 = vpop.f32.mrb[0].mxu0 }
 0x19e   :  { %v1815_v30 = vpop.f32.mrb[1].mxu0 }
 0x19f   :  { %v1816_v31 = vadd.f32 %v1815_v30, %v1814_v29  ;;  %v1817_v32 = vpop.f32.mrb[2].mxu0 }
 0x1a0   :  { %v1818_v33 = vpop.f32.mrb[3].mxu0 }
 0x1a1   :  { %v1819_v34 = vadd.f32 %v1818_v33, %v1817_v32  ;;  %v1158_v44 = vadd.f32 %v1816_v31, %v1029_v15 }
 0x1a3   :  { %v1161_v48 = vadd.f32 %v1819_v34, %v1034_v23 }
 0x1a5   :  { %v1820_v35 = vpop.f32.mrb[4].mxu0 }
 0x1a6   :  { %v1821_v36 = vpop.f32.mrb[5].mxu0 }
 0x1a7   :  { %v1822_v37 = vadd.f32 %v1821_v36, %v1820_v35  ;;  %v1823_v38 = vpop.f32.mrb[6].mxu0  ;;  %v952_v36 = vld [vmem:[#allocation3] sm:$0xff] }
 0x1a8   :  { %v1824_v39 = vpop.f32.mrb[7].mxu0 }
 0x1a9   :  { %v1825_v40 = vadd.f32 %v1824_v39, %v1823_v38  ;;  %v1166_v52 = vadd.f32 %v1822_v37, %v1039_v25  ;;  %v953_v37 = vld [vmem:[#allocation3 + $0x8] sm:$0xff]  ;;  %v954_v39 = vld [vmem:[#allocation3 + $0x10] sm:$0xff] }
 0x1ab   :  { %v1169_v55 = vadd.f32 %v1825_v40, %v1044_v24 }
 0x1fd   :  { %v1842_v42 = vpop.f32.mrb[0].mxu1 }
 0x1fe   :  { %v1843_v43 = vpop.f32.mrb[1].mxu1 }
 0x1ff   :  { %v1844_v45 = vadd.f32 %v1843_v43, %v1842_v42  ;;  %v1845_v46 = vpop.f32.mrb[2].mxu1 }
 0x200   :  { %v1846_v47 = vpop.f32.mrb[3].mxu1 }
 0x201   :  { %v1207_v49 = vadd.f32 %v1844_v45, %v1158_v44  ;;  %v1847_v50 = vadd.f32 %v1846_v47, %v1845_v46  ;;  %v955_v45 = vld [vmem:[#allocation3 + $0x18] sm:$0xff] }
 0x203   :  { %v1210_v51 = vadd.f32 %v1847_v50, %v1161_v48 }
 0x205   :  { %v1848_v53 = vpop.f32.mrb[4].mxu1 }
 0x206   :  { %v1849_v54 = vpop.f32.mrb[5].mxu1 }
 0x207   :  { %v1850_v56 = vadd.f32 %v1849_v54, %v1848_v53  ;;  %v1851_v57 = vpop.f32.mrb[6].mxu1 }
 0x208   :  { %v1852_v58 = vpop.f32.mrb[7].mxu1 }
 0x209   :  { %v1215_v59 = vadd.f32 %v1850_v56, %v1166_v52  ;;  %v1853_v60 = vadd.f32 %v1852_v58, %v1851_v57 }
 0x20b   :  { %v1218_v61 = vadd.f32 %v1853_v60, %v1169_v55 }
 0x20e   :  { %v1870_v62 = vpop.f32.mrb[8].mxu0 }
 0x20f   :  { %v1871_v63 = vpop.f32.mrb[9].mxu0 }
 0x210   :  { %v1872_v0 = vadd.f32 %v1871_v63, %v1870_v62  ;;  %v1873_v1 = vpop.f32.mrb[10].mxu0 }
 0x211   :  { %v1874_v2 = vpop.f32.mrb[11].mxu0 }
 0x212   :  { %v1875_v3 = vadd.f32 %v1874_v2, %v1873_v1  ;;  %v1256_v4 = vadd.f32 %v1872_v0, %v1207_v49 }
 0x214   :  { %v1259_v5 = vadd.f32 %v1875_v3, %v1210_v51 }
 0x216   :  { %v1876_v6 = vpop.f32.mrb[12].mxu0 }
 0x217   :  { %v1877_v7 = vpop.f32.mrb[13].mxu0  ;;  %v1900_v8 = vpop.f32.mrb[8].mxu1 }
 0x218   :  { %v1878_v9 = vadd.f32 %v1877_v7, %v1876_v6  ;;  %v1879_v10 = vpop.f32.mrb[14].mxu0  ;;  %v1304_v11 = vpop.f32.mrb[9].mxu1 }
 0x219   :  { %v1305_v12 = vadd.f32 %v1304_v11, %v1256_v4  ;;  %v1880_v13 = vpop.f32.mrb[15].mxu0  ;;  %v1901_v14 = vpop.f32.mrb[10].mxu1 }
 0x21a   :  { %v1264_v16 = vadd.f32 %v1878_v9, %v1215_v59  ;;  %v1881_v17 = vadd.f32 %v1880_v13, %v1879_v10  ;;  %v1307_v19 = vpop.f32.mrb[11].mxu1  ;;  %v1386_v13 = vpop.permute.xlu1 %1385 }
 0x21b   :  { %v1324_v20 = vmul.f32 0.70710677, %v1305_v12  ;;  %v1308_v21 = vadd.f32 %v1307_v19, %v1259_v5  ;;  %v1319_v27 = vmul.f32 0.5, %v1305_v12 }
 0x21c   :  { %v1313_v22 = vadd.f32 %v1900_v8, %v1264_v16  ;;  %v1267_v15 = vadd.f32 %v1881_v17, %v1218_v61 }
 0x21d   :  { %1995 = verf.f32 %v1324_v20  ;;  %v1325_v23 = vmul.f32 0.70710677, %v1308_v21  ;;  %v1320_v32 = vmul.f32 0.5, %v1308_v21 }
 0x21e   :  { %v1326_v24 = vmul.f32 0.70710677, %v1313_v22  ;;  %v1316_v25 = vadd.f32 %v1901_v14, %v1267_v15  ;;  %v1321_v34 = vmul.f32 0.5, %v1313_v22  ;;  %v1391_v14 = vpop.permute.xlu0 %1390  ;;  %v1414_v19 = vpop.permute.xlu1 %1413 }
 0x21f   :  { %1997 = verf.f32 %v1325_v23 }
 0x220   :  { %1999 = verf.f32 %v1326_v24  ;;  %v1327_v26 = vmul.f32 0.70710677, %v1316_v25  ;;  %v1322_v42 = vmul.f32 0.5, %v1316_v25 }
 0x222   :  { %2001 = verf.f32 %v1327_v26  ;;  %v1419_v20 = vpop.permute.xlu0 %1418  ;;  %v1396_v21 = vpop.permute.xlu1 %1395 }
 0x226   :  { %v1401_v22 = vpop.permute.xlu0 %1400 }
 0x227   :  { %v1996_v18 = vpop.eup %1995 }
 0x228   :  { %v1332_v28 = vadd.f32 1.0, %v1996_v18 }
 0x229   :  { %v1998_v29 = vpop.eup %1997 }
 0x22a   :  { %v2000_v30 = vpop.eup %1999  ;;  %v1336_v31 = vmul.f32 %v1332_v28, %v1319_v27  ;;  %v1333_v33 = vadd.f32 1.0, %v1998_v29 }
 0x22b   :  { %v1334_v35 = vadd.f32 1.0, %v2000_v30  ;;  %v1424_v30 = vpop.permute.xlu1 %1423 }
 0x22c   :  { %v2002_v38 = vpop.eup %2001  ;;  %v1337_v40 = vmul.f32 %v1333_v33, %v1320_v32  ;;  %v1340_v44 = vadd.f32 %v1336_v31, %v952_v36  ;;  %v1429_v31 = vpop.permute.xlu0 %1428 }
 0x22d   :  { %v1338_v41 = vmul.f32 %v1334_v35, %v1321_v34  ;;  %v1335_v43 = vadd.f32 1.0, %v2002_v38  ;;  %v1990_v38 = vld [vmem:[%s2592_s5 + $0x8] sm:$0xff]  }
 0x22e   :  { %v1341_v46 = vadd.f32 %v1337_v40, %v953_v37  ;;  %v1992_v40 = vld [vmem:[%s2592_s5 + $0x18] sm:$0xff]  }
 0x22f   :  { %v1342_v47 = vadd.f32 %v1338_v41, %v954_v39  ;;  %v1339_v48 = vmul.f32 %v1335_v43, %v1322_v42  ;;  %v1991_v39 = vld [vmem:[%s2592_s5 + $0x10] sm:$0xff]   ;;  %v1993_v41 = vld [vmem:[%s2592_s5 + $0x20] sm:$0xff]   ;;  %v1994_v42 = vld [vmem:[%s2592_s5 + $0x28] sm:$0xff]   ;;  %v1464_v43 = vpop.permute.xlu1 %1463 }
 0x230   :  { %v1344_v49 = vadd.f32 %v1341_v46, %v1340_v44 }
 0x231   :  { %v1343_v50 = vadd.f32 %v1339_v48, %v955_v45 }
 0x232   :  { %v1345_v51 = vadd.f32 %v1344_v49, %v1342_v47 }
 0x233   :  { %v1474_v45 = vpop.permute.xlu1 %1473 }
 0x234   :  { %v1346_v52 = vadd.f32 %v1345_v51, %v1343_v50 }
 0x236   :  { %v1347_v53 = vrot.slane %v1346_v52, 4 }
 0x238   :  { %v1348_v54 = vadd.f32 %v1347_v53, %v1346_v52 }
 0x23a   :  { %v1349_v55 = vrot.slane %v1348_v54, 2 }
 0x23c   :  { %v1350_v56 = vadd.f32 %v1349_v55, %v1348_v54 }
 0x23e   :  { %v1351_v57 = vrot.slane %v1350_v56, 1 }
 0x240   :  { %v1352_v58 = vadd.f32 %v1351_v57, %v1350_v56 }
 0x242   :  { %v1354_v59 = vmul.f32 0.03125, %v1352_v58 }
 0x244   :  { %v1356_v60 = vsub.f32 %v1341_v46, %v1354_v59  ;;  %v1355_v61 = vsub.f32 %v1340_v44, %v1354_v59  ;;  %v1357_v62 = vsub.f32 %v1342_v47, %v1354_v59  ;;  %v1358_v63 = vsub.f32 %v1343_v50, %v1354_v59  ;;  %v1469_v44 = vpop.permute.xlu0 %1468  ;;  %v1484_v47 = vpop.permute.xlu1 %1483 }
 0x246   :  { %v1360_v0 = vmul.f32 %v1356_v60, %v1356_v60  ;;  %v1359_v1 = vmul.f32 %v1355_v61, %v1355_v61  ;;  %v1361_v2 = vmul.f32 %v1357_v62, %v1357_v62  ;;  %v1362_v4 = vmul.f32 %v1358_v63, %v1358_v63 }
 0x248   :  { %v1363_v3 = vadd.f32 %v1360_v0, %v1359_v1  ;;  %v1479_v46 = vpop.permute.xlu0 %1478  ;;  %v1494_v56 = vpop.permute.xlu1 %1493 }
 0x24a   :  { %v1364_v5 = vadd.f32 %v1363_v3, %v1361_v2 }
 0x24c   :  { %v1365_v6 = vadd.f32 %v1364_v5, %v1362_v4  ;;  %v1489_v48 = vpop.permute.xlu0 %1488 }
 0x24e   :  { %v1366_v7 = vrot.slane %v1365_v6, 4 }
 0x250   :  { %v1367_v8 = vadd.f32 %v1366_v7, %v1365_v6  ;;  %v1499_v58 = vpop.permute.xlu0 %1498 }
 0x252   :  { %v1368_v9 = vrot.slane %v1367_v8, 2 }
 0x254   :  { %v1369_v10 = vadd.f32 %v1368_v9, %v1367_v8  ;;  %v1509_v3 = vpop.permute.xlu0 %1508 }
 0x256   :  { %v1370_v11 = vrot.slane %v1369_v10, 1 }
 0x258   :  { %v1371_v12 = vadd.f32 %v1370_v11, %v1369_v10  ;;  %v1519_v9 = vpop.permute.xlu0 %1518 }
 0x25a   :  { %v1372_v16 = vmul.f32 0.03125, %v1371_v12 }
 0x25c   :  { %v1373_v17 = vadd.f32 1e-05, %v1372_v16 }
 0x25e   :  { %2003 = vrsqrt.f32 %v1373_v17 }
 0x268   :  { %v2004_v15 = vpop.eup %2003 }
 0x269   :  { %v1375_v23 = vmul.f32 %v2004_v15, %v1355_v61  ;;  %v1376_v24 = vmul.f32 %v2004_v15, %v1356_v60  ;;  %v1377_v25 = vmul.f32 %v2004_v15, %v1357_v62  ;;  %v1378_v26 = vmul.f32 %v2004_v15, %v1358_v63  ;;  %v1504_v62 = vpop.permute.xlu1 %1503 }
 0x26b   :  { %v1403_v18 = vmul.f32 %v1386_v13, %v1375_v23  ;;  %v1404_v27 = vmul.f32 %v1391_v14, %v1376_v24  ;;  %v1405_v28 = vmul.f32 %v1396_v21, %v1377_v25  ;;  %v1406_v29 = vmul.f32 %v1401_v22, %v1378_v26 }
 0x26d   :  { %v1431_v32 = vadd.f32 %v1414_v19, %v1403_v18  ;;  %v1432_v33 = vadd.f32 %v1419_v20, %v1404_v27  ;;  %v1433_v34 = vadd.f32 %v1424_v30, %v1405_v28  ;;  %v1434_v35 = vadd.f32 %v1429_v31, %v1406_v29  ;;  %v1514_v5 = vpop.permute.xlu1 %1513 }
 0x26f   :  { %v1447_v36 = vpack.c.bf16 %v1432_v33, %v1431_v32  ;;  %v1448_v37 = vpack.c.bf16 %v1434_v35, %v1433_v34 }
 0x271   :  { %1902 = vmatprep.subr.bf16.mxu1 %v1447_v36 }
 0x272   :  { %1903 = vmatpush3.bf16.msra.mxu1 %v1447_v36 }
 0x273   :  { %1904 = vmatprep.subr.bf16.mxu1 %v1448_v37 }
 0x276   :  { %1905 = vmatpush3.bf16.msra.mxu1 %v1448_v37 }
 0x279   :  { %1907 = vmatmul.mubr.msk.bf16.vlgmr.msra.gmra.mrb[12].mxu1 %vm1116_vm3, %v1990_v38 }
 0x27a   :  { %1910 = vmatprep.mubr.msk.bf16.mxu1 %vm1116_vm3, %v1991_v39 }
 0x281   :  { %1911 = vmatmul.mubr.msk.bf16.gmra.mrb[16].mxu1 %vm1116_vm3, %v1992_v40 }
 0x282   :  { %1914 = vmatprep.mubr.msk.bf16.mxu1 %vm1116_vm3, %v1993_v41 }
 0x289   :  { %1915 = vmatmul.mubr.msk.bf16.gmra.mrb[20].mxu1 %vm1116_vm3, %v1994_v42 }
 0x34c   :  { %v1908_v49 = vpop.f32.mrb[12].mxu1 }
 0x34d   :  { %v1612_v50 = vadd.f32 %v1908_v49, %v1474_v45  ;;  %v1603_v51 = vpop.f32.mrb[13].mxu1 }
 0x34e   :  { %v1604_v52 = vadd.f32 %v1603_v51, %v1464_v43  ;;  %v1909_v53 = vpop.f32.mrb[14].mxu1 }
 0x34f   :  { %1652 = vst [vmem:[%s2593_s7 + $0x10] sm:$0xff] %v1612_v50  ;;  %v1615_v54 = vadd.f32 %v1909_v53, %v1479_v46  ;;  %v1606_v55 = vpop.f32.mrb[15].mxu1 }
 0x350   :  { %1650 = vst [vmem:[%s2593_s7] sm:$0xff] %v1604_v52  ;;  %v1607_v57 = vadd.f32 %v1606_v55, %v1469_v44 }
 0x351   :  { %1653 = vst [vmem:[%s2593_s7 + $0x18] sm:$0xff] %v1615_v54 }
 0x352   :  { %1651 = vst [vmem:[%s2593_s7 + $0x8] sm:$0xff] %v1607_v57 }
 0x354   :  { %v1912_v59 = vpop.f32.mrb[16].mxu1 }
 0x355   :  { %v1628_v60 = vadd.f32 %v1912_v59, %v1494_v56  ;;  %v1619_v61 = vpop.f32.mrb[17].mxu1 }
 0x356   :  { %v1620_v63 = vadd.f32 %v1619_v61, %v1484_v47  ;;  %v1913_v0 = vpop.f32.mrb[18].mxu1 }
 0x357   :  { %1656 = vst [vmem:[%s2593_s7 + $0x30] sm:$0xff] %v1628_v60  ;;  %v1631_v1 = vadd.f32 %v1913_v0, %v1499_v58  ;;  %v1622_v2 = vpop.f32.mrb[19].mxu1 }
 0x358   :  { %1654 = vst [vmem:[%s2593_s7 + $0x20] sm:$0xff] %v1620_v63  ;;  %v1623_v4 = vadd.f32 %v1622_v2, %v1489_v48 }
 0x359   :  { %1657 = vst [vmem:[%s2593_s7 + $0x38] sm:$0xff] %v1631_v1 }
 0x35a   :  { %1655 = vst [vmem:[%s2593_s7 + $0x28] sm:$0xff] %v1623_v4 }
 0x35c   :  { %v1916_v6 = vpop.f32.mrb[20].mxu1 }
 0x35d   :  { %v1644_v7 = vadd.f32 %v1916_v6, %v1514_v5  ;;  %v1635_v8 = vpop.f32.mrb[21].mxu1 }
 0x35e   :  { %v1636_v10 = vadd.f32 %v1635_v8, %v1504_v62  ;;  %v1917_v11 = vpop.f32.mrb[22].mxu1 }
 0x35f   :  { %1660 = vst [vmem:[%s2593_s7 + $0x50] sm:$0xff] %v1644_v7  ;;  %v1647_v12 = vadd.f32 %v1917_v11, %v1519_v9  ;;  %v1638_v13 = vpop.f32.mrb[23].mxu1 }
 0x360   :  { %1658 = vst [vmem:[%s2593_s7 + $0x40] sm:$0xff] %v1636_v10  ;;  %v1639_v14 = vadd.f32 %v1638_v13, %v1509_v3 }
 0x361   :  { %1661 = vst [vmem:[%s2593_s7 + $0x58] sm:$0xff] %v1647_v12 }
 0x362   :  { %1659 = vst [vmem:[%s2593_s7 + $0x48] sm:$0xff] %v1639_v14 }

</bundles_post_ra>
